<compile_context>
chip_gen: v7x
topology: tpu7x:2x2x1
jax: 0.10.0
libtpu: 0.0.40
codegen_flags: <defaults>
</compile_context>

<pallas_src>
import jax
import jax.numpy as jnp
from jax.experimental import pallas as pl
from jax.experimental.pallas import tpu as pltpu


_VMEM_SPEC = pl.BlockSpec(memory_space=pltpu.MemorySpace.VMEM)
_BP = 8  # batch padded to one f32 sublane tile


# ----------------------------------------------------------------------------
# Fused Pallas kernel: wavefront over (layer, time) + Linear head, one call.
# ----------------------------------------------------------------------------
def make_fused_kernel(T, B, H, L):
    """Kernel signature:
         kernel(x_ref, wih0, b0, wbig, b_1, ..., b_{L-1}, w_fc, b_fc, o_ref)
       x_ref : (T*8, Din)    time-major, batch padded to 8 (sublane tile)
       wih0  : (Din, 4H)     layer-0 input->gates (pre-transposed)
       b0    : (1, 4H)       layer-0 b_ih + b_hh
       wbig  : (L*H, L*4H)   block-banded fused recurrent weights:
                             rows l   -> cols l : Whh_l
                             rows l-1 -> cols l : Wih_l   (l >= 1)
       b_l   : (1, 4H)       folded biases of layers 1..L-1
       w_fc  : (H, Out), b_fc : (1, Out)
       o_ref : (B, Out)
       Gate order per 4H block (PyTorch): i, f, g, o.
    """
    H4 = 4 * H
    BP = _BP

    def kernel(x_ref, wih0_ref, b0_ref, wbig_ref, *rest):
        b_rest_refs = rest[: L - 1]
        w_fc_ref = rest[L - 1]
        b_fc_ref = rest[L]
        o_ref = rest[L + 1]

        # Hoisted layer-0 input projection: one MXU matmul for all T steps,
        # off the serial critical path.  (T*8, 4H); every 8-row group is one
        # aligned sublane tile -> per-step slices below are whole-tile views.
        gx0 = (
            jnp.dot(x_ref[...], wih0_ref[...], preferred_element_type=jnp.float32)
            + b0_ref[...]
        )

        wbig = wbig_ref[...]  # (L*H, L*4H)

        h = [jnp.zeros((BP, H), jnp.float32) for _ in range(L)]
        c = [jnp.zeros((BP, H), jnp.float32) for _ in range(L)]

        # Wavefront: step s updates layer l at time t = s - l (if valid).
        # All gate preactivations of a step depend only on previous-step
        # hidden states, so one fused matmul serves every active layer.
        for s in range(T + L - 1):
            hcat = h[0] if L == 1 else jnp.concatenate(h, axis=1)  # (8, L*H)
            G = jnp.dot(hcat, wbig, preferred_element_type=jnp.float32)  # (8, L*4H)

            new_h = list(h)
            new_c = list(c)
            for l in range(L):
                t = s - l
                if not (0 <= t < T):
                    continue  # static (unrolled) wavefront boundary
                g_l = G[:, l * H4:(l + 1) * H4]  # 128-aligned lane slice (free)
                if l == 0:
                    gates = g_l + gx0[t * BP:(t + 1) * BP, :]  # 8-aligned rows
                else:
                    gates = g_l + b_rest_refs[l - 1][...]
                # Two full-width EUP passes instead of four quarter-width ones.
                sig = jax.nn.sigmoid(gates)
                tah = jnp.tanh(gates)
                i_g = sig[:, 0:H]
                f_g = sig[:, H:2 * H]
                g_g = tah[:, 2 * H:3 * H]
                o_g = sig[:, 3 * H:4 * H]
                c_new = f_g * c[l] + i_g * g_g
                new_c[l] = c_new
                new_h[l] = o_g * jnp.tanh(c_new)
            h, c = new_h, new_c

        # FC head on the last layer's final hidden state; drop padded rows.
        y = (
            jnp.dot(h[L - 1], w_fc_ref[...], preferred_element_type=jnp.float32)
            + b_fc_ref[...]
        )
        o_ref[...] = y[:B, :]

    return kernel


@jax.jit
def worker_network_forward(x, lstm_params, fc_params):
    """x: (B, T, input_dim) float32 -> (B, output_dim) float32."""
    B, T, Din = x.shape
    L = len(lstm_params)
    H = lstm_params[0][1].shape[0]
    w_fc_t, b_fc = fc_params
    Out = w_fc_t.shape[1]
    BP = _BP
    assert B <= BP, "kernel assumes batch fits in one sublane tile"

    # Time-major, batch padded to one sublane tile, flattened:
    # row t*8 + b is (time t, batch b); pad rows carry a harmless zero-input
    # LSTM trajectory that never mixes across rows and is dropped at the end.
    xt = jnp.transpose(x, (1, 0, 2)).astype(jnp.float32)           # (T, B, Din)
    x_flat = jnp.pad(xt, ((0, 0), (0, BP - B), (0, 0))).reshape(T * BP, Din)

    wih0, _, b0 = lstm_params[0]

    # Block-banded fused recurrent weight (tiny; assembled per call under jit —
    # precompute once at load time in a real deployment).
    W_big = jnp.zeros((L * H, L * 4 * H), jnp.float32)
    for l in range(L):
        wih_l, whh_l, _ = lstm_params[l]
        W_big = W_big.at[l * H:(l + 1) * H, l * 4 * H:(l + 1) * 4 * H].set(whh_l)
        if l >= 1:
            W_big = W_big.at[(l - 1) * H:l * H, l * 4 * H:(l + 1) * 4 * H].set(wih_l)
    b_rest = [lstm_params[l][2] for l in range(1, L)]

    inputs = (x_flat, wih0, b0, W_big, *b_rest, w_fc_t, b_fc)
    n_in = len(inputs)

    # Advisory cost hint (kernel is microseconds-scale & latency bound).
    flops = (
        2 * T * BP * Din * 4 * H                       # hoisted input proj
        + (T + L - 1) * 2 * BP * (L * H) * (L * 4 * H)  # fused recurrence
        + 2 * BP * H * Out                              # FC head
    )
    transcendentals = T * L * (2 * BP * 4 * H + BP * H)
    bytes_accessed = sum(int(a.size) * 4 for a in inputs) + B * Out * 4

    kernel = make_fused_kernel(T, B, H, L)
    y = pl.pallas_call(
        kernel,
        out_shape=jax.ShapeDtypeStruct((B, Out), jnp.float32),
        in_specs=[_VMEM_SPEC] * n_in,
        out_specs=_VMEM_SPEC,
        cost_estimate=pl.CostEstimate(
            flops=flops,
            transcendentals=transcendentals,
            bytes_accessed=bytes_accessed,
        ),
    )(*inputs)
    return y


# ----------------------------------------------------------------------------
# Pure-JAX reference (mirrors torch.nn.LSTM + Linear semantics)
# ----------------------------------------------------------------------------
def reference_forward(x, lstm_params, fc_params):
    B, T, _ = x.shape
    seq = jnp.transpose(x, (1, 0, 2)).astype(jnp.float32)
    for wih_t, whh_t, b in lstm_params:
        H = whh_t.shape[0]
        h = jnp.zeros((B, H), jnp.float32)
        c = jnp.zeros((B, H), jnp.float32)
        outs = []
        for t in range(T):
            gates = seq[t] @ wih_t + h @ whh_t + b
            i = jax.nn.sigmoid(gates[:, 0:H])
            f = jax.nn.sigmoid(gates[:, H:2 * H])
            g = jnp.tanh(gates[:, 2 * H:3 * H])
            o = jax.nn.sigmoid(gates[:, 3 * H:4 * H])
            c = f * c + i * g
            h = o * jnp.tanh(c)
            outs.append(h)
        seq = jnp.stack(outs, axis=0)
    w_fc_t, b_fc = fc_params
    return seq[-1] @ w_fc_t + b_fc


# ----------------------------------------------------------------------------
# Deterministic parameter construction (shapes from MasterNetwork __init__)
# ----------------------------------------------------------------------------
def make_params(key, input_dim, hidden_dim, layer_dim, output_dim):
    lstm_params = []
    scale = 1.0 / jnp.sqrt(hidden_dim)
    for layer in range(layer_dim):
        d_in = input_dim if layer == 0 else hidden_dim
        key, k1, k2, k3, k4 = jax.random.split(key, 5)
        w_ih = jax.random.uniform(k1, (4 * hidden_dim, d_in), jnp.float32,
                                  -scale, scale)
        w_hh = jax.random.uniform(k2, (4 * hidden_dim, hidden_dim), jnp.float32,
                                  -scale, scale)
        b_ih = jax.random.uniform(k3, (4 * hidden_dim,), jnp.float32,
                                  -scale, scale)
        b_hh = jax.random.uniform(k4, (4 * hidden_dim,), jnp.float32,
                                  -scale, scale)
        # Pre-transpose weights for the kernel; fold the two biases together.
        lstm_params.append(
            (w_ih.T, w_hh.T, (b_ih + b_hh).reshape(1, 4 * hidden_dim))
        )
    key, k5, k6 = jax.random.split(key, 3)
    fc_scale = 1.0 / jnp.sqrt(hidden_dim)
    w_fc = jax.random.uniform(k5, (output_dim, hidden_dim), jnp.float32,
                              -fc_scale, fc_scale)
    b_fc = jax.random.uniform(k6, (output_dim,), jnp.float32,
                              -fc_scale, fc_scale)
    fc_params = (w_fc.T, b_fc.reshape(1, output_dim))
    return lstm_params, fc_params


if __name__ == "__main__":
    # Small shapes implied by (input_dim, hidden_dim, layer_dim, output_dim).
    batch, seq_len = 2, 8
    input_dim, hidden_dim, layer_dim, output_dim = 16, 32, 2, 4

    key = jax.random.PRNGKey(0)
    key, kx = jax.random.split(key)
    x = jax.random.normal(kx, (batch, seq_len, input_dim), jnp.float32)

    lstm_params, fc_params = make_params(
        key, input_dim, hidden_dim, layer_dim, output_dim
    )

    y = worker_network_forward(x, lstm_params, fc_params)
    y = jax.block_until_ready(y)

    y_ref = reference_forward(x, lstm_params, fc_params)
    assert y.shape == (batch, output_dim)
    assert jnp.allclose(y, y_ref, atol=1e-4, rtol=1e-4), "mismatch vs reference"

    print("KERNEL_OK")
</pallas_src>

<mosaic_0001>
module attributes {stable_mosaic.version = 11 : i64} {
  func.func @kernel(%arg0: memref<64x16xf32, #tpu.memory_space<vmem>>, %arg1: memref<16x128xf32, #tpu.memory_space<vmem>>, %arg2: memref<1x128xf32, #tpu.memory_space<vmem>>, %arg3: memref<64x256xf32, #tpu.memory_space<vmem>>, %arg4: memref<1x128xf32, #tpu.memory_space<vmem>>, %arg5: memref<32x4xf32, #tpu.memory_space<vmem>>, %arg6: memref<1x4xf32, #tpu.memory_space<vmem>>, %arg7: memref<2x4xf32, #tpu.memory_space<vmem>>) attributes {dimension_semantics = [], scalar_prefetch = 0 : i64, scratch_operands = 0 : i64, tpu.core_type = #tpu.core_type<tc>} {
    %c0 = arith.constant 0 : index
    %c0_0 = arith.constant 0 : index
    %0 = vector.load %arg0[%c0, %c0_0] : memref<64x16xf32, #tpu.memory_space<vmem>>, vector<64x16xf32>
    %c0_1 = arith.constant 0 : index
    %c0_2 = arith.constant 0 : index
    %1 = vector.load %arg1[%c0_1, %c0_2] : memref<16x128xf32, #tpu.memory_space<vmem>>, vector<16x128xf32>
    %cst = arith.constant dense<0.000000e+00> : vector<64x128xf32>
    %2 = tpu.matmul %0, %1, %cst {dimension_numbers = #tpu.dot_dimension_numbers<[1], [0], [0], [1], [0, 0, 1, 1], [], []>} : vector<64x16xf32>, vector<16x128xf32>, vector<64x128xf32> -> vector<64x128xf32>
    %c0_3 = arith.constant 0 : index
    %c0_4 = arith.constant 0 : index
    %3 = vector.load %arg2[%c0_3, %c0_4] : memref<1x128xf32, #tpu.memory_space<vmem>>, vector<1x128xf32>
    %4 = vector.broadcast %3 : vector<1x128xf32> to vector<64x128xf32>
    %5 = arith.addf %2, %4 : vector<64x128xf32>
    %c0_5 = arith.constant 0 : index
    %c0_6 = arith.constant 0 : index
    %6 = vector.load %arg3[%c0_5, %c0_6] : memref<64x256xf32, #tpu.memory_space<vmem>>, vector<64x256xf32>
    %cst_7 = arith.constant 0.000000e+00 : f32
    %7 = vector.broadcast %cst_7 : f32 to vector<8x32xf32>
    %cst_8 = arith.constant 0.000000e+00 : f32
    %8 = vector.broadcast %cst_8 : f32 to vector<8x32xf32>
    %cst_9 = arith.constant 0.000000e+00 : f32
    %9 = vector.broadcast %cst_9 : f32 to vector<8x32xf32>
    %cst_10 = arith.constant 0.000000e+00 : f32
    %10 = vector.broadcast %cst_10 : f32 to vector<8x32xf32>
    %11 = tpu.concatenate %7, %8 in 1 : vector<8x32xf32>, vector<8x32xf32> -> vector<8x64xf32>
    %cst_11 = arith.constant dense<0.000000e+00> : vector<8x256xf32>
    %12 = tpu.matmul %11, %6, %cst_11 {dimension_numbers = #tpu.dot_dimension_numbers<[1], [0], [0], [1], [0, 0, 1, 1], [], []>} : vector<8x64xf32>, vector<64x256xf32>, vector<8x256xf32> -> vector<8x256xf32>
    %13 = vector.extract_strided_slice %12 {offsets = [0, 0], sizes = [8, 128], strides = [1, 1]} : vector<8x256xf32> to vector<8x128xf32>
    %14 = vector.extract_strided_slice %5 {offsets = [0, 0], sizes = [8, 128], strides = [1, 1]} : vector<64x128xf32> to vector<8x128xf32>
    %15 = arith.addf %13, %14 : vector<8x128xf32>
    %16 = arith.negf %15 : vector<8x128xf32>
    %17 = math.exp %16 : vector<8x128xf32>
    %cst_12 = arith.constant 1.000000e+00 : f32
    %18 = vector.broadcast %cst_12 : f32 to vector<8x128xf32>
    %19 = arith.addf %18, %17 : vector<8x128xf32>
    %20 = arith.divf %18, %19 : vector<8x128xf32>
    %21 = math.tanh %15 : vector<8x128xf32>
    %22 = vector.extract_strided_slice %20 {offsets = [0, 0], sizes = [8, 32], strides = [1, 1]} : vector<8x128xf32> to vector<8x32xf32>
    %23 = vector.extract_strided_slice %20 {offsets = [0, 32], sizes = [8, 32], strides = [1, 1]} : vector<8x128xf32> to vector<8x32xf32>
    %24 = vector.extract_strided_slice %21 {offsets = [0, 64], sizes = [8, 32], strides = [1, 1]} : vector<8x128xf32> to vector<8x32xf32>
    %25 = vector.extract_strided_slice %20 {offsets = [0, 96], sizes = [8, 32], strides = [1, 1]} : vector<8x128xf32> to vector<8x32xf32>
    %26 = arith.mulf %23, %9 : vector<8x32xf32>
    %27 = arith.mulf %22, %24 : vector<8x32xf32>
    %28 = arith.addf %26, %27 : vector<8x32xf32>
    %29 = math.tanh %28 : vector<8x32xf32>
    %30 = arith.mulf %25, %29 : vector<8x32xf32>
    %31 = tpu.concatenate %30, %8 in 1 : vector<8x32xf32>, vector<8x32xf32> -> vector<8x64xf32>
    %cst_13 = arith.constant dense<0.000000e+00> : vector<8x256xf32>
    %32 = tpu.matmul %31, %6, %cst_13 {dimension_numbers = #tpu.dot_dimension_numbers<[1], [0], [0], [1], [0, 0, 1, 1], [], []>} : vector<8x64xf32>, vector<64x256xf32>, vector<8x256xf32> -> vector<8x256xf32>
    %33 = vector.extract_strided_slice %32 {offsets = [0, 0], sizes = [8, 128], strides = [1, 1]} : vector<8x256xf32> to vector<8x128xf32>
    %34 = vector.extract_strided_slice %5 {offsets = [8, 0], sizes = [8, 128], strides = [1, 1]} : vector<64x128xf32> to vector<8x128xf32>
    %35 = arith.addf %33, %34 : vector<8x128xf32>
    %36 = arith.negf %35 : vector<8x128xf32>
    %37 = math.exp %36 : vector<8x128xf32>
    %cst_14 = arith.constant 1.000000e+00 : f32
    %38 = vector.broadcast %cst_14 : f32 to vector<8x128xf32>
    %39 = arith.addf %38, %37 : vector<8x128xf32>
    %40 = arith.divf %38, %39 : vector<8x128xf32>
    %41 = math.tanh %35 : vector<8x128xf32>
    %42 = vector.extract_strided_slice %40 {offsets = [0, 0], sizes = [8, 32], strides = [1, 1]} : vector<8x128xf32> to vector<8x32xf32>
    %43 = vector.extract_strided_slice %40 {offsets = [0, 32], sizes = [8, 32], strides = [1, 1]} : vector<8x128xf32> to vector<8x32xf32>
    %44 = vector.extract_strided_slice %41 {offsets = [0, 64], sizes = [8, 32], strides = [1, 1]} : vector<8x128xf32> to vector<8x32xf32>
    %45 = vector.extract_strided_slice %40 {offsets = [0, 96], sizes = [8, 32], strides = [1, 1]} : vector<8x128xf32> to vector<8x32xf32>
    %46 = arith.mulf %43, %28 : vector<8x32xf32>
    %47 = arith.mulf %42, %44 : vector<8x32xf32>
    %48 = arith.addf %46, %47 : vector<8x32xf32>
    %49 = math.tanh %48 : vector<8x32xf32>
    %50 = arith.mulf %45, %49 : vector<8x32xf32>
    %51 = vector.extract_strided_slice %32 {offsets = [0, 128], sizes = [8, 128], strides = [1, 1]} : vector<8x256xf32> to vector<8x128xf32>
    %c0_15 = arith.constant 0 : index
    %c0_16 = arith.constant 0 : index
    %52 = vector.load %arg4[%c0_15, %c0_16] : memref<1x128xf32, #tpu.memory_space<vmem>>, vector<1x128xf32>
    %53 = vector.broadcast %52 : vector<1x128xf32> to vector<8x128xf32>
    %54 = arith.addf %51, %53 : vector<8x128xf32>
    %55 = arith.negf %54 : vector<8x128xf32>
    %56 = math.exp %55 : vector<8x128xf32>
    %cst_17 = arith.constant 1.000000e+00 : f32
    %57 = vector.broadcast %cst_17 : f32 to vector<8x128xf32>
    %58 = arith.addf %57, %56 : vector<8x128xf32>
    %59 = arith.divf %57, %58 : vector<8x128xf32>
    %60 = math.tanh %54 : vector<8x128xf32>
    %61 = vector.extract_strided_slice %59 {offsets = [0, 0], sizes = [8, 32], strides = [1, 1]} : vector<8x128xf32> to vector<8x32xf32>
    %62 = vector.extract_strided_slice %59 {offsets = [0, 32], sizes = [8, 32], strides = [1, 1]} : vector<8x128xf32> to vector<8x32xf32>
    %63 = vector.extract_strided_slice %60 {offsets = [0, 64], sizes = [8, 32], strides = [1, 1]} : vector<8x128xf32> to vector<8x32xf32>
    %64 = vector.extract_strided_slice %59 {offsets = [0, 96], sizes = [8, 32], strides = [1, 1]} : vector<8x128xf32> to vector<8x32xf32>
    %65 = arith.mulf %62, %10 : vector<8x32xf32>
    %66 = arith.mulf %61, %63 : vector<8x32xf32>
    %67 = arith.addf %65, %66 : vector<8x32xf32>
    %68 = math.tanh %67 : vector<8x32xf32>
    %69 = arith.mulf %64, %68 : vector<8x32xf32>
    %70 = tpu.concatenate %50, %69 in 1 : vector<8x32xf32>, vector<8x32xf32> -> vector<8x64xf32>
    %cst_18 = arith.constant dense<0.000000e+00> : vector<8x256xf32>
    %71 = tpu.matmul %70, %6, %cst_18 {dimension_numbers = #tpu.dot_dimension_numbers<[1], [0], [0], [1], [0, 0, 1, 1], [], []>} : vector<8x64xf32>, vector<64x256xf32>, vector<8x256xf32> -> vector<8x256xf32>
    %72 = vector.extract_strided_slice %71 {offsets = [0, 0], sizes = [8, 128], strides = [1, 1]} : vector<8x256xf32> to vector<8x128xf32>
    %73 = vector.extract_strided_slice %5 {offsets = [16, 0], sizes = [8, 128], strides = [1, 1]} : vector<64x128xf32> to vector<8x128xf32>
    %74 = arith.addf %72, %73 : vector<8x128xf32>
    %75 = arith.negf %74 : vector<8x128xf32>
    %76 = math.exp %75 : vector<8x128xf32>
    %cst_19 = arith.constant 1.000000e+00 : f32
    %77 = vector.broadcast %cst_19 : f32 to vector<8x128xf32>
    %78 = arith.addf %77, %76 : vector<8x128xf32>
    %79 = arith.divf %77, %78 : vector<8x128xf32>
    %80 = math.tanh %74 : vector<8x128xf32>
    %81 = vector.extract_strided_slice %79 {offsets = [0, 0], sizes = [8, 32], strides = [1, 1]} : vector<8x128xf32> to vector<8x32xf32>
    %82 = vector.extract_strided_slice %79 {offsets = [0, 32], sizes = [8, 32], strides = [1, 1]} : vector<8x128xf32> to vector<8x32xf32>
    %83 = vector.extract_strided_slice %80 {offsets = [0, 64], sizes = [8, 32], strides = [1, 1]} : vector<8x128xf32> to vector<8x32xf32>
    %84 = vector.extract_strided_slice %79 {offsets = [0, 96], sizes = [8, 32], strides = [1, 1]} : vector<8x128xf32> to vector<8x32xf32>
    %85 = arith.mulf %82, %48 : vector<8x32xf32>
    %86 = arith.mulf %81, %83 : vector<8x32xf32>
    %87 = arith.addf %85, %86 : vector<8x32xf32>
    %88 = math.tanh %87 : vector<8x32xf32>
    %89 = arith.mulf %84, %88 : vector<8x32xf32>
    %90 = vector.extract_strided_slice %71 {offsets = [0, 128], sizes = [8, 128], strides = [1, 1]} : vector<8x256xf32> to vector<8x128xf32>
    %c0_20 = arith.constant 0 : index
    %c0_21 = arith.constant 0 : index
    %91 = vector.load %arg4[%c0_20, %c0_21] : memref<1x128xf32, #tpu.memory_space<vmem>>, vector<1x128xf32>
    %92 = vector.broadcast %91 : vector<1x128xf32> to vector<8x128xf32>
    %93 = arith.addf %90, %92 : vector<8x128xf32>
    %94 = arith.negf %93 : vector<8x128xf32>
    %95 = math.exp %94 : vector<8x128xf32>
    %cst_22 = arith.constant 1.000000e+00 : f32
    %96 = vector.broadcast %cst_22 : f32 to vector<8x128xf32>
    %97 = arith.addf %96, %95 : vector<8x128xf32>
    %98 = arith.divf %96, %97 : vector<8x128xf32>
    %99 = math.tanh %93 : vector<8x128xf32>
    %100 = vector.extract_strided_slice %98 {offsets = [0, 0], sizes = [8, 32], strides = [1, 1]} : vector<8x128xf32> to vector<8x32xf32>
    %101 = vector.extract_strided_slice %98 {offsets = [0, 32], sizes = [8, 32], strides = [1, 1]} : vector<8x128xf32> to vector<8x32xf32>
    %102 = vector.extract_strided_slice %99 {offsets = [0, 64], sizes = [8, 32], strides = [1, 1]} : vector<8x128xf32> to vector<8x32xf32>
    %103 = vector.extract_strided_slice %98 {offsets = [0, 96], sizes = [8, 32], strides = [1, 1]} : vector<8x128xf32> to vector<8x32xf32>
    %104 = arith.mulf %101, %67 : vector<8x32xf32>
    %105 = arith.mulf %100, %102 : vector<8x32xf32>
    %106 = arith.addf %104, %105 : vector<8x32xf32>
    %107 = math.tanh %106 : vector<8x32xf32>
    %108 = arith.mulf %103, %107 : vector<8x32xf32>
    %109 = tpu.concatenate %89, %108 in 1 : vector<8x32xf32>, vector<8x32xf32> -> vector<8x64xf32>
    %cst_23 = arith.constant dense<0.000000e+00> : vector<8x256xf32>
    %110 = tpu.matmul %109, %6, %cst_23 {dimension_numbers = #tpu.dot_dimension_numbers<[1], [0], [0], [1], [0, 0, 1, 1], [], []>} : vector<8x64xf32>, vector<64x256xf32>, vector<8x256xf32> -> vector<8x256xf32>
    %111 = vector.extract_strided_slice %110 {offsets = [0, 0], sizes = [8, 128], strides = [1, 1]} : vector<8x256xf32> to vector<8x128xf32>
    %112 = vector.extract_strided_slice %5 {offsets = [24, 0], sizes = [8, 128], strides = [1, 1]} : vector<64x128xf32> to vector<8x128xf32>
    %113 = arith.addf %111, %112 : vector<8x128xf32>
    %114 = arith.negf %113 : vector<8x128xf32>
    %115 = math.exp %114 : vector<8x128xf32>
    %cst_24 = arith.constant 1.000000e+00 : f32
    %116 = vector.broadcast %cst_24 : f32 to vector<8x128xf32>
    %117 = arith.addf %116, %115 : vector<8x128xf32>
    %118 = arith.divf %116, %117 : vector<8x128xf32>
    %119 = math.tanh %113 : vector<8x128xf32>
    %120 = vector.extract_strided_slice %118 {offsets = [0, 0], sizes = [8, 32], strides = [1, 1]} : vector<8x128xf32> to vector<8x32xf32>
    %121 = vector.extract_strided_slice %118 {offsets = [0, 32], sizes = [8, 32], strides = [1, 1]} : vector<8x128xf32> to vector<8x32xf32>
    %122 = vector.extract_strided_slice %119 {offsets = [0, 64], sizes = [8, 32], strides = [1, 1]} : vector<8x128xf32> to vector<8x32xf32>
    %123 = vector.extract_strided_slice %118 {offsets = [0, 96], sizes = [8, 32], strides = [1, 1]} : vector<8x128xf32> to vector<8x32xf32>
    %124 = arith.mulf %121, %87 : vector<8x32xf32>
    %125 = arith.mulf %120, %122 : vector<8x32xf32>
    %126 = arith.addf %124, %125 : vector<8x32xf32>
    %127 = math.tanh %126 : vector<8x32xf32>
    %128 = arith.mulf %123, %127 : vector<8x32xf32>
    %129 = vector.extract_strided_slice %110 {offsets = [0, 128], sizes = [8, 128], strides = [1, 1]} : vector<8x256xf32> to vector<8x128xf32>
    %c0_25 = arith.constant 0 : index
    %c0_26 = arith.constant 0 : index
    %130 = vector.load %arg4[%c0_25, %c0_26] : memref<1x128xf32, #tpu.memory_space<vmem>>, vector<1x128xf32>
    %131 = vector.broadcast %130 : vector<1x128xf32> to vector<8x128xf32>
    %132 = arith.addf %129, %131 : vector<8x128xf32>
    %133 = arith.negf %132 : vector<8x128xf32>
    %134 = math.exp %133 : vector<8x128xf32>
    %cst_27 = arith.constant 1.000000e+00 : f32
    %135 = vector.broadcast %cst_27 : f32 to vector<8x128xf32>
    %136 = arith.addf %135, %134 : vector<8x128xf32>
    %137 = arith.divf %135, %136 : vector<8x128xf32>
    %138 = math.tanh %132 : vector<8x128xf32>
    %139 = vector.extract_strided_slice %137 {offsets = [0, 0], sizes = [8, 32], strides = [1, 1]} : vector<8x128xf32> to vector<8x32xf32>
    %140 = vector.extract_strided_slice %137 {offsets = [0, 32], sizes = [8, 32], strides = [1, 1]} : vector<8x128xf32> to vector<8x32xf32>
    %141 = vector.extract_strided_slice %138 {offsets = [0, 64], sizes = [8, 32], strides = [1, 1]} : vector<8x128xf32> to vector<8x32xf32>
    %142 = vector.extract_strided_slice %137 {offsets = [0, 96], sizes = [8, 32], strides = [1, 1]} : vector<8x128xf32> to vector<8x32xf32>
    %143 = arith.mulf %140, %106 : vector<8x32xf32>
    %144 = arith.mulf %139, %141 : vector<8x32xf32>
    %145 = arith.addf %143, %144 : vector<8x32xf32>
    %146 = math.tanh %145 : vector<8x32xf32>
    %147 = arith.mulf %142, %146 : vector<8x32xf32>
    %148 = tpu.concatenate %128, %147 in 1 : vector<8x32xf32>, vector<8x32xf32> -> vector<8x64xf32>
    %cst_28 = arith.constant dense<0.000000e+00> : vector<8x256xf32>
    %149 = tpu.matmul %148, %6, %cst_28 {dimension_numbers = #tpu.dot_dimension_numbers<[1], [0], [0], [1], [0, 0, 1, 1], [], []>} : vector<8x64xf32>, vector<64x256xf32>, vector<8x256xf32> -> vector<8x256xf32>
    %150 = vector.extract_strided_slice %149 {offsets = [0, 0], sizes = [8, 128], strides = [1, 1]} : vector<8x256xf32> to vector<8x128xf32>
    %151 = vector.extract_strided_slice %5 {offsets = [32, 0], sizes = [8, 128], strides = [1, 1]} : vector<64x128xf32> to vector<8x128xf32>
    %152 = arith.addf %150, %151 : vector<8x128xf32>
    %153 = arith.negf %152 : vector<8x128xf32>
    %154 = math.exp %153 : vector<8x128xf32>
    %cst_29 = arith.constant 1.000000e+00 : f32
    %155 = vector.broadcast %cst_29 : f32 to vector<8x128xf32>
    %156 = arith.addf %155, %154 : vector<8x128xf32>
    %157 = arith.divf %155, %156 : vector<8x128xf32>
    %158 = math.tanh %152 : vector<8x128xf32>
    %159 = vector.extract_strided_slice %157 {offsets = [0, 0], sizes = [8, 32], strides = [1, 1]} : vector<8x128xf32> to vector<8x32xf32>
    %160 = vector.extract_strided_slice %157 {offsets = [0, 32], sizes = [8, 32], strides = [1, 1]} : vector<8x128xf32> to vector<8x32xf32>
    %161 = vector.extract_strided_slice %158 {offsets = [0, 64], sizes = [8, 32], strides = [1, 1]} : vector<8x128xf32> to vector<8x32xf32>
    %162 = vector.extract_strided_slice %157 {offsets = [0, 96], sizes = [8, 32], strides = [1, 1]} : vector<8x128xf32> to vector<8x32xf32>
    %163 = arith.mulf %160, %126 : vector<8x32xf32>
    %164 = arith.mulf %159, %161 : vector<8x32xf32>
    %165 = arith.addf %163, %164 : vector<8x32xf32>
    %166 = math.tanh %165 : vector<8x32xf32>
    %167 = arith.mulf %162, %166 : vector<8x32xf32>
    %168 = vector.extract_strided_slice %149 {offsets = [0, 128], sizes = [8, 128], strides = [1, 1]} : vector<8x256xf32> to vector<8x128xf32>
    %c0_30 = arith.constant 0 : index
    %c0_31 = arith.constant 0 : index
    %169 = vector.load %arg4[%c0_30, %c0_31] : memref<1x128xf32, #tpu.memory_space<vmem>>, vector<1x128xf32>
    %170 = vector.broadcast %169 : vector<1x128xf32> to vector<8x128xf32>
    %171 = arith.addf %168, %170 : vector<8x128xf32>
    %172 = arith.negf %171 : vector<8x128xf32>
    %173 = math.exp %172 : vector<8x128xf32>
    %cst_32 = arith.constant 1.000000e+00 : f32
    %174 = vector.broadcast %cst_32 : f32 to vector<8x128xf32>
    %175 = arith.addf %174, %173 : vector<8x128xf32>
    %176 = arith.divf %174, %175 : vector<8x128xf32>
    %177 = math.tanh %171 : vector<8x128xf32>
    %178 = vector.extract_strided_slice %176 {offsets = [0, 0], sizes = [8, 32], strides = [1, 1]} : vector<8x128xf32> to vector<8x32xf32>
    %179 = vector.extract_strided_slice %176 {offsets = [0, 32], sizes = [8, 32], strides = [1, 1]} : vector<8x128xf32> to vector<8x32xf32>
    %180 = vector.extract_strided_slice %177 {offsets = [0, 64], sizes = [8, 32], strides = [1, 1]} : vector<8x128xf32> to vector<8x32xf32>
    %181 = vector.extract_strided_slice %176 {offsets = [0, 96], sizes = [8, 32], strides = [1, 1]} : vector<8x128xf32> to vector<8x32xf32>
    %182 = arith.mulf %179, %145 : vector<8x32xf32>
    %183 = arith.mulf %178, %180 : vector<8x32xf32>
    %184 = arith.addf %182, %183 : vector<8x32xf32>
    %185 = math.tanh %184 : vector<8x32xf32>
    %186 = arith.mulf %181, %185 : vector<8x32xf32>
    %187 = tpu.concatenate %167, %186 in 1 : vector<8x32xf32>, vector<8x32xf32> -> vector<8x64xf32>
    %cst_33 = arith.constant dense<0.000000e+00> : vector<8x256xf32>
    %188 = tpu.matmul %187, %6, %cst_33 {dimension_numbers = #tpu.dot_dimension_numbers<[1], [0], [0], [1], [0, 0, 1, 1], [], []>} : vector<8x64xf32>, vector<64x256xf32>, vector<8x256xf32> -> vector<8x256xf32>
    %189 = vector.extract_strided_slice %188 {offsets = [0, 0], sizes = [8, 128], strides = [1, 1]} : vector<8x256xf32> to vector<8x128xf32>
    %190 = vector.extract_strided_slice %5 {offsets = [40, 0], sizes = [8, 128], strides = [1, 1]} : vector<64x128xf32> to vector<8x128xf32>
    %191 = arith.addf %189, %190 : vector<8x128xf32>
    %192 = arith.negf %191 : vector<8x128xf32>
    %193 = math.exp %192 : vector<8x128xf32>
    %cst_34 = arith.constant 1.000000e+00 : f32
    %194 = vector.broadcast %cst_34 : f32 to vector<8x128xf32>
    %195 = arith.addf %194, %193 : vector<8x128xf32>
    %196 = arith.divf %194, %195 : vector<8x128xf32>
    %197 = math.tanh %191 : vector<8x128xf32>
    %198 = vector.extract_strided_slice %196 {offsets = [0, 0], sizes = [8, 32], strides = [1, 1]} : vector<8x128xf32> to vector<8x32xf32>
    %199 = vector.extract_strided_slice %196 {offsets = [0, 32], sizes = [8, 32], strides = [1, 1]} : vector<8x128xf32> to vector<8x32xf32>
    %200 = vector.extract_strided_slice %197 {offsets = [0, 64], sizes = [8, 32], strides = [1, 1]} : vector<8x128xf32> to vector<8x32xf32>
    %201 = vector.extract_strided_slice %196 {offsets = [0, 96], sizes = [8, 32], strides = [1, 1]} : vector<8x128xf32> to vector<8x32xf32>
    %202 = arith.mulf %199, %165 : vector<8x32xf32>
    %203 = arith.mulf %198, %200 : vector<8x32xf32>
    %204 = arith.addf %202, %203 : vector<8x32xf32>
    %205 = math.tanh %204 : vector<8x32xf32>
    %206 = arith.mulf %201, %205 : vector<8x32xf32>
    %207 = vector.extract_strided_slice %188 {offsets = [0, 128], sizes = [8, 128], strides = [1, 1]} : vector<8x256xf32> to vector<8x128xf32>
    %c0_35 = arith.constant 0 : index
    %c0_36 = arith.constant 0 : index
    %208 = vector.load %arg4[%c0_35, %c0_36] : memref<1x128xf32, #tpu.memory_space<vmem>>, vector<1x128xf32>
    %209 = vector.broadcast %208 : vector<1x128xf32> to vector<8x128xf32>
    %210 = arith.addf %207, %209 : vector<8x128xf32>
    %211 = arith.negf %210 : vector<8x128xf32>
    %212 = math.exp %211 : vector<8x128xf32>
    %cst_37 = arith.constant 1.000000e+00 : f32
    %213 = vector.broadcast %cst_37 : f32 to vector<8x128xf32>
    %214 = arith.addf %213, %212 : vector<8x128xf32>
    %215 = arith.divf %213, %214 : vector<8x128xf32>
    %216 = math.tanh %210 : vector<8x128xf32>
    %217 = vector.extract_strided_slice %215 {offsets = [0, 0], sizes = [8, 32], strides = [1, 1]} : vector<8x128xf32> to vector<8x32xf32>
    %218 = vector.extract_strided_slice %215 {offsets = [0, 32], sizes = [8, 32], strides = [1, 1]} : vector<8x128xf32> to vector<8x32xf32>
    %219 = vector.extract_strided_slice %216 {offsets = [0, 64], sizes = [8, 32], strides = [1, 1]} : vector<8x128xf32> to vector<8x32xf32>
    %220 = vector.extract_strided_slice %215 {offsets = [0, 96], sizes = [8, 32], strides = [1, 1]} : vector<8x128xf32> to vector<8x32xf32>
    %221 = arith.mulf %218, %184 : vector<8x32xf32>
    %222 = arith.mulf %217, %219 : vector<8x32xf32>
    %223 = arith.addf %221, %222 : vector<8x32xf32>
    %224 = math.tanh %223 : vector<8x32xf32>
    %225 = arith.mulf %220, %224 : vector<8x32xf32>
    %226 = tpu.concatenate %206, %225 in 1 : vector<8x32xf32>, vector<8x32xf32> -> vector<8x64xf32>
    %cst_38 = arith.constant dense<0.000000e+00> : vector<8x256xf32>
    %227 = tpu.matmul %226, %6, %cst_38 {dimension_numbers = #tpu.dot_dimension_numbers<[1], [0], [0], [1], [0, 0, 1, 1], [], []>} : vector<8x64xf32>, vector<64x256xf32>, vector<8x256xf32> -> vector<8x256xf32>
    %228 = vector.extract_strided_slice %227 {offsets = [0, 0], sizes = [8, 128], strides = [1, 1]} : vector<8x256xf32> to vector<8x128xf32>
    %229 = vector.extract_strided_slice %5 {offsets = [48, 0], sizes = [8, 128], strides = [1, 1]} : vector<64x128xf32> to vector<8x128xf32>
    %230 = arith.addf %228, %229 : vector<8x128xf32>
    %231 = arith.negf %230 : vector<8x128xf32>
    %232 = math.exp %231 : vector<8x128xf32>
    %cst_39 = arith.constant 1.000000e+00 : f32
    %233 = vector.broadcast %cst_39 : f32 to vector<8x128xf32>
    %234 = arith.addf %233, %232 : vector<8x128xf32>
    %235 = arith.divf %233, %234 : vector<8x128xf32>
    %236 = math.tanh %230 : vector<8x128xf32>
    %237 = vector.extract_strided_slice %235 {offsets = [0, 0], sizes = [8, 32], strides = [1, 1]} : vector<8x128xf32> to vector<8x32xf32>
    %238 = vector.extract_strided_slice %235 {offsets = [0, 32], sizes = [8, 32], strides = [1, 1]} : vector<8x128xf32> to vector<8x32xf32>
    %239 = vector.extract_strided_slice %236 {offsets = [0, 64], sizes = [8, 32], strides = [1, 1]} : vector<8x128xf32> to vector<8x32xf32>
    %240 = vector.extract_strided_slice %235 {offsets = [0, 96], sizes = [8, 32], strides = [1, 1]} : vector<8x128xf32> to vector<8x32xf32>
    %241 = arith.mulf %238, %204 : vector<8x32xf32>
    %242 = arith.mulf %237, %239 : vector<8x32xf32>
    %243 = arith.addf %241, %242 : vector<8x32xf32>
    %244 = math.tanh %243 : vector<8x32xf32>
    %245 = arith.mulf %240, %244 : vector<8x32xf32>
    %246 = vector.extract_strided_slice %227 {offsets = [0, 128], sizes = [8, 128], strides = [1, 1]} : vector<8x256xf32> to vector<8x128xf32>
    %c0_40 = arith.constant 0 : index
    %c0_41 = arith.constant 0 : index
    %247 = vector.load %arg4[%c0_40, %c0_41] : memref<1x128xf32, #tpu.memory_space<vmem>>, vector<1x128xf32>
    %248 = vector.broadcast %247 : vector<1x128xf32> to vector<8x128xf32>
    %249 = arith.addf %246, %248 : vector<8x128xf32>
    %250 = arith.negf %249 : vector<8x128xf32>
    %251 = math.exp %250 : vector<8x128xf32>
    %cst_42 = arith.constant 1.000000e+00 : f32
    %252 = vector.broadcast %cst_42 : f32 to vector<8x128xf32>
    %253 = arith.addf %252, %251 : vector<8x128xf32>
    %254 = arith.divf %252, %253 : vector<8x128xf32>
    %255 = math.tanh %249 : vector<8x128xf32>
    %256 = vector.extract_strided_slice %254 {offsets = [0, 0], sizes = [8, 32], strides = [1, 1]} : vector<8x128xf32> to vector<8x32xf32>
    %257 = vector.extract_strided_slice %254 {offsets = [0, 32], sizes = [8, 32], strides = [1, 1]} : vector<8x128xf32> to vector<8x32xf32>
    %258 = vector.extract_strided_slice %255 {offsets = [0, 64], sizes = [8, 32], strides = [1, 1]} : vector<8x128xf32> to vector<8x32xf32>
    %259 = vector.extract_strided_slice %254 {offsets = [0, 96], sizes = [8, 32], strides = [1, 1]} : vector<8x128xf32> to vector<8x32xf32>
    %260 = arith.mulf %257, %223 : vector<8x32xf32>
    %261 = arith.mulf %256, %258 : vector<8x32xf32>
    %262 = arith.addf %260, %261 : vector<8x32xf32>
    %263 = math.tanh %262 : vector<8x32xf32>
    %264 = arith.mulf %259, %263 : vector<8x32xf32>
    %265 = tpu.concatenate %245, %264 in 1 : vector<8x32xf32>, vector<8x32xf32> -> vector<8x64xf32>
    %cst_43 = arith.constant dense<0.000000e+00> : vector<8x256xf32>
    %266 = tpu.matmul %265, %6, %cst_43 {dimension_numbers = #tpu.dot_dimension_numbers<[1], [0], [0], [1], [0, 0, 1, 1], [], []>} : vector<8x64xf32>, vector<64x256xf32>, vector<8x256xf32> -> vector<8x256xf32>
    %267 = vector.extract_strided_slice %266 {offsets = [0, 0], sizes = [8, 128], strides = [1, 1]} : vector<8x256xf32> to vector<8x128xf32>
    %268 = vector.extract_strided_slice %5 {offsets = [56, 0], sizes = [8, 128], strides = [1, 1]} : vector<64x128xf32> to vector<8x128xf32>
    %269 = arith.addf %267, %268 : vector<8x128xf32>
    %270 = arith.negf %269 : vector<8x128xf32>
    %271 = math.exp %270 : vector<8x128xf32>
    %cst_44 = arith.constant 1.000000e+00 : f32
    %272 = vector.broadcast %cst_44 : f32 to vector<8x128xf32>
    %273 = arith.addf %272, %271 : vector<8x128xf32>
    %274 = arith.divf %272, %273 : vector<8x128xf32>
    %275 = math.tanh %269 : vector<8x128xf32>
    %276 = vector.extract_strided_slice %274 {offsets = [0, 0], sizes = [8, 32], strides = [1, 1]} : vector<8x128xf32> to vector<8x32xf32>
    %277 = vector.extract_strided_slice %274 {offsets = [0, 32], sizes = [8, 32], strides = [1, 1]} : vector<8x128xf32> to vector<8x32xf32>
    %278 = vector.extract_strided_slice %275 {offsets = [0, 64], sizes = [8, 32], strides = [1, 1]} : vector<8x128xf32> to vector<8x32xf32>
    %279 = vector.extract_strided_slice %274 {offsets = [0, 96], sizes = [8, 32], strides = [1, 1]} : vector<8x128xf32> to vector<8x32xf32>
    %280 = arith.mulf %277, %243 : vector<8x32xf32>
    %281 = arith.mulf %276, %278 : vector<8x32xf32>
    %282 = arith.addf %280, %281 : vector<8x32xf32>
    %283 = math.tanh %282 : vector<8x32xf32>
    %284 = arith.mulf %279, %283 : vector<8x32xf32>
    %285 = vector.extract_strided_slice %266 {offsets = [0, 128], sizes = [8, 128], strides = [1, 1]} : vector<8x256xf32> to vector<8x128xf32>
    %c0_45 = arith.constant 0 : index
    %c0_46 = arith.constant 0 : index
    %286 = vector.load %arg4[%c0_45, %c0_46] : memref<1x128xf32, #tpu.memory_space<vmem>>, vector<1x128xf32>
    %287 = vector.broadcast %286 : vector<1x128xf32> to vector<8x128xf32>
    %288 = arith.addf %285, %287 : vector<8x128xf32>
    %289 = arith.negf %288 : vector<8x128xf32>
    %290 = math.exp %289 : vector<8x128xf32>
    %cst_47 = arith.constant 1.000000e+00 : f32
    %291 = vector.broadcast %cst_47 : f32 to vector<8x128xf32>
    %292 = arith.addf %291, %290 : vector<8x128xf32>
    %293 = arith.divf %291, %292 : vector<8x128xf32>
    %294 = math.tanh %288 : vector<8x128xf32>
    %295 = vector.extract_strided_slice %293 {offsets = [0, 0], sizes = [8, 32], strides = [1, 1]} : vector<8x128xf32> to vector<8x32xf32>
    %296 = vector.extract_strided_slice %293 {offsets = [0, 32], sizes = [8, 32], strides = [1, 1]} : vector<8x128xf32> to vector<8x32xf32>
    %297 = vector.extract_strided_slice %294 {offsets = [0, 64], sizes = [8, 32], strides = [1, 1]} : vector<8x128xf32> to vector<8x32xf32>
    %298 = vector.extract_strided_slice %293 {offsets = [0, 96], sizes = [8, 32], strides = [1, 1]} : vector<8x128xf32> to vector<8x32xf32>
    %299 = arith.mulf %296, %262 : vector<8x32xf32>
    %300 = arith.mulf %295, %297 : vector<8x32xf32>
    %301 = arith.addf %299, %300 : vector<8x32xf32>
    %302 = math.tanh %301 : vector<8x32xf32>
    %303 = arith.mulf %298, %302 : vector<8x32xf32>
    %304 = tpu.concatenate %284, %303 in 1 : vector<8x32xf32>, vector<8x32xf32> -> vector<8x64xf32>
    %cst_48 = arith.constant dense<0.000000e+00> : vector<8x256xf32>
    %305 = tpu.matmul %304, %6, %cst_48 {dimension_numbers = #tpu.dot_dimension_numbers<[1], [0], [0], [1], [0, 0, 1, 1], [], []>} : vector<8x64xf32>, vector<64x256xf32>, vector<8x256xf32> -> vector<8x256xf32>
    %306 = vector.extract_strided_slice %305 {offsets = [0, 128], sizes = [8, 128], strides = [1, 1]} : vector<8x256xf32> to vector<8x128xf32>
    %c0_49 = arith.constant 0 : index
    %c0_50 = arith.constant 0 : index
    %307 = vector.load %arg4[%c0_49, %c0_50] : memref<1x128xf32, #tpu.memory_space<vmem>>, vector<1x128xf32>
    %308 = vector.broadcast %307 : vector<1x128xf32> to vector<8x128xf32>
    %309 = arith.addf %306, %308 : vector<8x128xf32>
    %310 = arith.negf %309 : vector<8x128xf32>
    %311 = math.exp %310 : vector<8x128xf32>
    %cst_51 = arith.constant 1.000000e+00 : f32
    %312 = vector.broadcast %cst_51 : f32 to vector<8x128xf32>
    %313 = arith.addf %312, %311 : vector<8x128xf32>
    %314 = arith.divf %312, %313 : vector<8x128xf32>
    %315 = math.tanh %309 : vector<8x128xf32>
    %316 = vector.extract_strided_slice %314 {offsets = [0, 0], sizes = [8, 32], strides = [1, 1]} : vector<8x128xf32> to vector<8x32xf32>
    %317 = vector.extract_strided_slice %314 {offsets = [0, 32], sizes = [8, 32], strides = [1, 1]} : vector<8x128xf32> to vector<8x32xf32>
    %318 = vector.extract_strided_slice %315 {offsets = [0, 64], sizes = [8, 32], strides = [1, 1]} : vector<8x128xf32> to vector<8x32xf32>
    %319 = vector.extract_strided_slice %314 {offsets = [0, 96], sizes = [8, 32], strides = [1, 1]} : vector<8x128xf32> to vector<8x32xf32>
    %320 = arith.mulf %317, %301 : vector<8x32xf32>
    %321 = arith.mulf %316, %318 : vector<8x32xf32>
    %322 = arith.addf %320, %321 : vector<8x32xf32>
    %323 = math.tanh %322 : vector<8x32xf32>
    %324 = arith.mulf %319, %323 : vector<8x32xf32>
    %c0_52 = arith.constant 0 : index
    %c0_53 = arith.constant 0 : index
    %325 = vector.load %arg5[%c0_52, %c0_53] : memref<32x4xf32, #tpu.memory_space<vmem>>, vector<32x4xf32>
    %cst_54 = arith.constant dense<0.000000e+00> : vector<8x4xf32>
    %326 = tpu.matmul %324, %325, %cst_54 {dimension_numbers = #tpu.dot_dimension_numbers<[1], [0], [0], [1], [0, 0, 1, 1], [], []>} : vector<8x32xf32>, vector<32x4xf32>, vector<8x4xf32> -> vector<8x4xf32>
    %c0_55 = arith.constant 0 : index
    %c0_56 = arith.constant 0 : index
    %327 = vector.load %arg6[%c0_55, %c0_56] : memref<1x4xf32, #tpu.memory_space<vmem>>, vector<1x4xf32>
    %328 = vector.broadcast %327 : vector<1x4xf32> to vector<8x4xf32>
    %329 = arith.addf %326, %328 : vector<8x4xf32>
    %330 = vector.extract_strided_slice %329 {offsets = [0, 0], sizes = [2, 4], strides = [1, 1]} : vector<8x4xf32> to vector<2x4xf32>
    %c0_57 = arith.constant 0 : index
    %c0_58 = arith.constant 0 : index
    %331 = vector.load %arg7[%c0_57, %c0_58] : memref<2x4xf32, #tpu.memory_space<vmem>>, vector<2x4xf32>
    tpu.vector_store %arg7[%c0_57, %c0_58], %330 {strides = array<i32>} : memref<2x4xf32, #tpu.memory_space<vmem>>, vector<2x4xf32>,
    return
  }
}

</mosaic_0001>

<bundles_post_ra>
// kernel: worker_network_forward.1
= control target key start
LH: loop header
LB: loop body
LE: loop exit
PB: predicated region body
PF: predicated region fallthrough
CT: control target
= control target key end

     0   :  { %v1823_v7 = vmov 0.0   ;;  %vm44_vm0 = vcmask 130048   ;;  %s2213_s0 = inlined_call_operand.vmem [shape: f32[64,16], index: 0, kind: input, shape index: {}]   ;;  %s2214_s1 = inlined_call_operand.vmem [shape: f32[16,128], index: 1, kind: input, shape index: {}]   ;;  %s2215_s2 = inlined_call_operand.vmem [shape: f32[1,128], index: 2, kind: input, shape index: {}]   ;;  %s2216_s3 = inlined_call_operand.vmem [shape: f32[64,256], index: 3, kind: input, shape index: {}]   ;;  %s2217_s4 = inlined_call_operand.vmem [shape: f32[1,128], index: 4, kind: input, shape index: {}]   ;;  %s2218_s5 = inlined_call_operand.vmem [shape: f32[32,4], index: 5, kind: input, shape index: {}]   ;;  %s2219_s6 = inlined_call_operand.vmem [shape: f32[1,4], index: 6, kind: input, shape index: {}]   ;;  %s2220_s7 = inlined_call_operand.hbm [shape: f32[2,4], index: 7, kind: output, shape index: {}]  }
   0x1   :  { %v175_v0 = vld [vmem:[%s2216_s3 + $0x8] sm:$0xff]  ;;  %v177_v1 = vld [vmem:[%s2216_s3 + $0x18] sm:$0xff]  ;;  %v174_v2 = vld [vmem:[%s2216_s3] sm:$0xff]  ;;  %258 = vmatprep.mubr.f32.mxu1 %v1823_v7 }
   0x2   :  { %v1878_v3 = vpack.c.bf16 %v177_v1, %v175_v0  ;;  %v176_v4 = vld [vmem:[%s2216_s3 + $0x10] sm:$0xff]  ;;  %v179_v5 = vld [vmem:[%s2216_s3 + $0x28] sm:$0xff]  ;;  %v181_v6 = vld [vmem:[%s2216_s3 + $0x38] sm:$0xff] }
   0x3   :  { %v1890_v8 = vpack.c.bf16 %v176_v4, %v174_v2  ;;  %v1892_v9 = vpack.c.bf16 %v181_v6, %v179_v5  ;;  %v178_v10 = vld [vmem:[%s2216_s3 + $0x20] sm:$0xff]  ;;  %v180_v11 = vld [vmem:[%s2216_s3 + $0x30] sm:$0xff]  ;;  %v36_v13 = vld [vmem:[%s2214_s1 + $0x8] sm:$0xff] }
   0x4   :  { %v35_v12 = vld [vmem:[%s2214_s1] sm:$0xff]  ;;  %1516 = vmatprep.subr.bf16.mxu1 %v1878_v3  ;;  %v183_v14 = vld [vmem:[%s2216_s3 + $0x48] sm:$0xff]  ;;  %v185_v15 = vld [vmem:[%s2216_s3 + $0x58] sm:$0xff]  ;;  %v1914_v16 = vpack.c.bf16 %v180_v11, %v178_v10 }
   0x5   :  { %1518 = vmatpush1.bf16.msra.mxu1 %v1890_v8  ;;  %v1511_v17 = vpack.c.bf16 %v36_v13, %v35_v12  ;;  %v27_v18 = vld [vmem:[%s2213_s0] sm:$0xff]  ;;  %v1920_v19 = vpack.c.bf16 %v185_v15, %v183_v14  ;;  %v184_v21 = vld [vmem:[%s2216_s3 + $0x50] sm:$0xff]  ;;  %v187_v22 = vld [vmem:[%s2216_s3 + $0x68] sm:$0xff] }
   0x6   :  { %1520 = vmatprep.subr.bf16.mxu1 %v1892_v9  ;;  %v182_v20 = vld [vmem:[%s2216_s3 + $0x40] sm:$0xff]  ;;  %1488 = vmatprep.mubr.msk.f32.mxu0 %vm44_vm0, %v27_v18  ;;  %v189_v23 = vld [vmem:[%s2216_s3 + $0x78] sm:$0xff] }
   0x7   :  { %1512 = vmatprep.subr.bf16.mxu0 %v1511_v17 }
   0x8   :  { %12 = vsyncpa [#allocation3], 0  ;;  %1514 = vmatpush3.bf16.msra.mxu0 %v1511_v17  ;;  %v28_v24 = vld [vmem:[%s2213_s0 + $0x8] sm:$0xff]  ;;  %v1939_v25 = vpack.c.bf16 %v184_v21, %v182_v20  ;;  %v1943_v26 = vpack.c.bf16 %v189_v23, %v187_v22  ;;  %v186_v27 = vld [vmem:[%s2216_s3 + $0x60] sm:$0xff]  ;;  %s1824_s18 = smov 64   ;;  %vm293_vm1 = vcmask 261120  }
   0x9   :  { %1522 = vmatpush1.bf16.msra.mxu1 %v1914_v16  ;;  %1532 = vmatprep.subr.bf16.mxu0 %v1878_v3  ;;  %v188_v28 = vld [vmem:[%s2216_s3 + $0x70] sm:$0xff]  ;;  %v1981_v32 = vld [vmem:[%s2215_s2] ss:$0 sm:$0xff]  ;;  %s1825_s2 = smov 32   ;;  %v30_v48 = vld [vmem:[%s2213_s0 + $0x18] sm:$0xff]  ;;  %vm190_vm2 = vcmask 523264  }
   0xa   :  { %1524 = vmatprep.subr.bf16.mxu1 %v1920_v19  ;;  %v1954_v29 = vpack.c.bf16 %v188_v28, %v186_v27  ;;  %v29_v47 = vld [vmem:[%s2213_s0 + $0x10] sm:$0xff]  ;;  %v31_v49 = vld [vmem:[%s2213_s0 + $0x20] sm:$0xff]  ;;  %v32_v50 = vld [vmem:[%s2213_s0 + $0x28] sm:$0xff]  ;;  %vm1827_vm3 = vmmov 0   ;;  %vm1417_vm4 = vcmask 25600  }
   0xb   :  { %1489 = vmatmul.mubr.msk.f32.vlgmr.msra.gmra.mrb[0].mxu0 %vm44_vm0, %v28_v24  ;;  %v33_v51 = vld [vmem:[%s2213_s0 + $0x30] sm:$0xff]  ;;  %v34_v52 = vld [vmem:[%s2213_s0 + $0x38] sm:$0xff]  ;;  %v2044_v1 = vld [vmem:[%s2217_s4] ss:$0 sm:$0xff] }
   0xc   :  { %1534 = vmatpush1.bf16.msra.mxu0 %v1890_v8  ;;  %1491 = vmatprep.mubr.msk.f32.mxu0 %vm44_vm0, %v29_v47 }
   0xd   :  { %1526 = vmatpush1.bf16.msra.mxu1 %v1939_v25  ;;  %1536 = vmatprep.subr.bf16.mxu0 %v1892_v9 }
   0xe   :  { %1528 = vmatprep.subr.bf16.mxu1 %v1943_v26 }
   0xf   :  { %1492 = vmatmul.mubr.msk.f32.gmra.mrb[2].mxu0 %vm44_vm0, %v30_v48 }
  0x10   :  { %1538 = vmatpush1.bf16.msra.mxu0 %v1914_v16  ;;  %1494 = vmatprep.mubr.msk.f32.mxu0 %vm44_vm0, %v31_v49 }
  0x11   :  { %1530 = vmatpush1.bf16.msra.mxu1 %v1954_v29  ;;  %1540 = vmatprep.subr.bf16.mxu0 %v1920_v19 }
  0x12   :  { %1548 = vmatprep.subr.bf16.mxu1 %v1878_v3 }
  0x13   :  { %1495 = vmatmul.mubr.msk.f32.gmra.mrb[4].mxu0 %vm44_vm0, %v32_v50 }
  0x14   :  { %259 = vmatmul.mubr.f32.vlgmr.msra.gmra.mrb[0].mxu1 %v1823_v7  ;;  %1542 = vmatpush1.bf16.msra.mxu0 %v1939_v25 }
  0x15   :  { %1544 = vmatprep.subr.bf16.mxu0 %v1943_v26  ;;  %1550 = vmatpush1.bf16.msra.mxu1 %v1890_v8 }
  0x16   :  { %1552 = vmatprep.subr.bf16.mxu1 %v1892_v9  ;;  %502 = vmatprep.mubr.f32.mxu1 %v1823_v7 }
  0x17   :  { %1497 = vmatprep.mubr.msk.f32.mxu0 %vm44_vm0, %v33_v51 }
  0x18   :  { %1546 = vmatpush1.bf16.msra.mxu0 %v1954_v29 }
  0x19   :  { %1554 = vmatpush1.bf16.msra.mxu1 %v1914_v16  ;;  %1564 = vmatprep.subr.bf16.mxu0 %v1878_v3 }
  0x1a   :  { %1556 = vmatprep.subr.bf16.mxu1 %v1920_v19  ;;  %1498 = vmatmul.mubr.msk.f32.gmra.mrb[6].mxu0 %vm44_vm0, %v34_v52 }
  0x1b   :  { %362 = vmatprep.mubr.f32.mxu0 %v1823_v7 }
  0x1d   :  { %1558 = vmatpush1.bf16.msra.mxu1 %v1939_v25 }
  0x1e   :  { %1560 = vmatprep.subr.bf16.mxu1 %v1943_v26 }
  0x21   :  { %1562 = vmatpush1.bf16.msra.mxu1 %v1954_v29 }
  0x22   :  { %1580 = vmatprep.subr.bf16.mxu1 %v1878_v3 }
  0xde   :  { %v1976_v30 = vpop.f32.mrb[0].mxu0 }
  0xdf   :  { %v135_v31 = vpop.f32.mrb[1].mxu0  ;;  %v141_v0 = vadd.f32 %v1976_v30, %v1981_v32 }
  0xe0   :  { %v136_v33 = vadd.f32 %v1981_v32, %v135_v31 }
  0xe2   :  { %v2016_v56 = vpop.f32.mrb[2].mxu0 }
  0xe3   :  { %v2018_v57 = vpop.f32.mrb[3].mxu0 }
  0xe6   :  { %v2020_v58 = vpop.f32.mrb[4].mxu0 }
  0xe7   :  { %v260_v34 = vpop.f32.mrb[0].mxu1  ;;  %v2022_v59 = vpop.f32.mrb[5].mxu0 }
  0xe8   :  { %v264_v35 = vadd.f32 %v260_v34, %v136_v33  ;;  %v262_v36 = vpop.f32.mrb[1].mxu1 }
  0xea   :  { %1671 = vtanh.f32 %v264_v35  ;;  %v1442_v38 = vmul.f32 -1.442695, %v264_v35 }
  0xec   :  { %1673 = vpow2.f32 %v1442_v38 }
  0xed   :  { %v2024_v60 = vpop.f32.mrb[6].mxu0 }
  0xee   :  { %v2026_v61 = vpop.f32.mrb[7].mxu0 }
  0xf4   :  { %v1672_v37 = vpop.eup %1671 }
  0xf5   :  { %274 = vrot.lane.b32.xlu0 %v1672_v37, %s1824_s18 }
  0xf6   :  { %v1674_v39 = vpop.eup %1673 }
  0xf7   :  { %v268_v40 = vadd.f32 1.0, %v1674_v39 }
  0xf9   :  { %1675 = vrcp.f32 %v268_v40 }
 0x103   :  { %v1676_v41 = vpop.eup %1675 }
 0x104   :  { %v272_v44 = vmul.f32 0.0, %v1676_v41 }
 0x167   :  { %v275_v42 = vpop.permute.xlu0 %274 }
 0x168   :  { %v277_v43 = vmul.f32 %v1676_v41, %v275_v42 }
 0x16a   :  { %279 = vrot.lane.b32.xlu0 %v277_v43, %s1825_s2 }
 0x1dc   :  { %v280_v45 = vpop.permute.xlu0 %279 }
 0x1dd   :  { %v1986_v46 = vadd.f32 %v280_v45, %v272_v44  ;;  %v146_v45 = vadd.f32 %v1981_v32, %v2018_v57 }
 0x1df   :  { %1677 = vtanh.f32 %v1986_v46 }
 0x1e9   :  { %v1678_v53 = vpop.eup %1677 }
 0x1ea   :  { %285 = vrot.lane.b32.xlu1 %v1678_v53, %s1824_s18 }
 0x25c   :  { %v286_v54 = vpop.permute.xlu1 %285 }
 0x25d   :  { %v288_v55 = vmul.f32 %v1676_v41, %v286_v54 }
 0x25f   :  { %290 = vrot.lane.b32.xlu1 %v288_v55, %s1825_s2 }
 0x2d1   :  { %v291_v62 = vpop.permute.xlu1 %290 }
 0x2d2   :  { %v294_v63 = vsel %vm293_vm1, %v291_v62, 0.0 }
 0x2d3   :  { %1443 = vmatmul.mubr.msk.f32.vlgmr.msra.gmra.mrb[8].mxu0 %vm190_vm2, %v294_v63 }
 0x2d4   :  { %1566 = vmatpush1.bf16.msra.mxu0 %v1890_v8  ;;  %635 = vmatprep.mubr.f32.mxu0 %v1823_v7 }
 0x2d5   :  { %1568 = vmatprep.subr.bf16.mxu0 %v1892_v9 }
 0x2d8   :  { %1570 = vmatpush1.bf16.msra.mxu0 %v1914_v16 }
 0x2d9   :  { %1572 = vmatprep.subr.bf16.mxu0 %v1920_v19 }
 0x2dc   :  { %1574 = vmatpush1.bf16.msra.mxu0 %v1939_v25 }
 0x2dd   :  { %1576 = vmatprep.subr.bf16.mxu0 %v1943_v26 }
 0x2e0   :  { %1578 = vmatpush1.bf16.msra.mxu0 %v1954_v29 }
 0x2e1   :  { %1596 = vmatprep.subr.bf16.mxu0 %v1878_v3 }
 0x3a6   :  { %v364_v2 = vpop.f32.mrb[8].mxu0 }
 0x3a7   :  { %v369_v4 = vadd.f32 %v364_v2, %v141_v0  ;;  %v366_v5 = vpop.f32.mrb[9].mxu0 }
 0x3a8   :  { %v401_v6 = vadd.f32 %v2044_v1, %v366_v5 }
 0x3a9   :  { %1679 = vtanh.f32 %v369_v4  ;;  %v1444_v12 = vmul.f32 -1.442695, %v369_v4 }
 0x3aa   :  { %1681 = vtanh.f32 %v401_v6  ;;  %v1446_v13 = vmul.f32 -1.442695, %v401_v6 }
 0x3ab   :  { %1683 = vpow2.f32 %v1444_v12 }
 0x3ac   :  { %1685 = vpow2.f32 %v1446_v13 }
 0x3b3   :  { %v1680_v10 = vpop.eup %1679 }
 0x3b4   :  { %v1682_v11 = vpop.eup %1681  ;;  %379 = vrot.lane.b32.xlu0 %v1680_v10, %s1824_s18 }
 0x3b5   :  { %411 = vrot.lane.b32.xlu1 %v1682_v11, %s1824_s18  ;;  %v1684_v14 = vpop.eup %1683 }
 0x3b6   :  { %v1686_v15 = vpop.eup %1685  ;;  %v373_v17 = vadd.f32 1.0, %v1684_v14 }
 0x3b7   :  { %v405_v18 = vadd.f32 1.0, %v1686_v15 }
 0x3b8   :  { %1687 = vrcp.f32 %v373_v17 }
 0x3b9   :  { %1689 = vrcp.f32 %v405_v18 }
 0x3c2   :  { %v1688_v20 = vpop.eup %1687 }
 0x3c3   :  { %v1690_v22 = vpop.eup %1689  ;;  %v377_v28 = vmul.f32 %v1688_v20, %v1986_v46 }
 0x3c4   :  { %v409_v31 = vmul.f32 0.0, %v1690_v22 }
 0x426   :  { %v380_v21 = vpop.permute.xlu0 %379 }
 0x427   :  { %v382_v23 = vmul.f32 %v1688_v20, %v380_v21  ;;  %v412_v24 = vpop.permute.xlu1 %411 }
 0x428   :  { %v414_v27 = vmul.f32 %v1690_v22, %v412_v24 }
 0x429   :  { %384 = vrot.lane.b32.xlu0 %v382_v23, %s1825_s2 }
 0x42a   :  { %416 = vrot.lane.b32.xlu1 %v414_v27, %s1825_s2 }
 0x49b   :  { %v385_v30 = vpop.permute.xlu0 %384 }
 0x49c   :  { %v387_v33 = vadd.f32 %v385_v30, %v377_v28  ;;  %v417_v34 = vpop.permute.xlu1 %416  ;;  %v151_v30 = vadd.f32 %v2016_v56, %v1981_v32 }
 0x49d   :  { %v419_v35 = vadd.f32 %v417_v34, %v409_v31 }
 0x49e   :  { %1691 = vtanh.f32 %v387_v33 }
 0x49f   :  { %1693 = vtanh.f32 %v419_v35 }
 0x4a8   :  { %v1692_v36 = vpop.eup %1691 }
 0x4a9   :  { %v1694_v37 = vpop.eup %1693  ;;  %390 = vrot.lane.b32.xlu0 %v1692_v36, %s1824_s18 }
 0x4aa   :  { %422 = vrot.lane.b32.xlu1 %v1694_v37, %s1824_s18 }
 0x51b   :  { %v391_v38 = vpop.permute.xlu0 %390 }
 0x51c   :  { %v393_v39 = vmul.f32 %v1688_v20, %v391_v38  ;;  %v423_v40 = vpop.permute.xlu1 %422 }
 0x51d   :  { %v425_v41 = vmul.f32 %v1690_v22, %v423_v40 }
 0x51e   :  { %427 = vrot.lane.b32.xlu0 %v393_v39, %s1825_s2 }
 0x51f   :  { %431 = vrot.lane.b32.xlu1 %v425_v41, %s1824_s18 }
 0x590   :  { %v428_v42 = vpop.permute.xlu0 %427 }
 0x591   :  { %v432_v43 = vpop.permute.xlu1 %431 }
 0x592   :  { %v434_v44 = vsel %vm293_vm1, %v428_v42, %v432_v43 }
 0x593   :  { %1447 = vmatmul.mubr.msk.f32.vlgmr.msra.gmra.mrb[2].mxu1 %vm190_vm2, %v434_v44 }
 0x594   :  { %1582 = vmatpush1.bf16.msra.mxu1 %v1890_v8  ;;  %768 = vmatprep.mubr.f32.mxu1 %v1823_v7 }
 0x595   :  { %1584 = vmatprep.subr.bf16.mxu1 %v1892_v9 }
 0x598   :  { %1586 = vmatpush1.bf16.msra.mxu1 %v1914_v16 }
 0x599   :  { %1588 = vmatprep.subr.bf16.mxu1 %v1920_v19 }
 0x59c   :  { %1590 = vmatpush1.bf16.msra.mxu1 %v1939_v25 }
 0x59d   :  { %1592 = vmatprep.subr.bf16.mxu1 %v1943_v26 }
 0x5a0   :  { %1594 = vmatpush1.bf16.msra.mxu1 %v1954_v29 }
 0x5a1   :  { %1612 = vmatprep.subr.bf16.mxu1 %v1878_v3 }
 0x666   :  { %v504_v46 = vpop.f32.mrb[2].mxu1 }
 0x667   :  { %v509_v47 = vadd.f32 %v504_v46, %v146_v45  ;;  %v506_v48 = vpop.f32.mrb[3].mxu1 }
 0x668   :  { %v534_v49 = vadd.f32 %v2044_v1, %v506_v48 }
 0x669   :  { %1695 = vtanh.f32 %v509_v47  ;;  %v1448_v52 = vmul.f32 -1.442695, %v509_v47 }
 0x66a   :  { %1697 = vtanh.f32 %v534_v49  ;;  %v1449_v53 = vmul.f32 -1.442695, %v534_v49 }
 0x66b   :  { %1699 = vpow2.f32 %v1448_v52 }
 0x66c   :  { %1701 = vpow2.f32 %v1449_v53 }
 0x673   :  { %v1696_v50 = vpop.eup %1695 }
 0x674   :  { %v1698_v51 = vpop.eup %1697  ;;  %519 = vrot.lane.b32.xlu0 %v1696_v50, %s1824_s18 }
 0x675   :  { %544 = vrot.lane.b32.xlu1 %v1698_v51, %s1824_s18  ;;  %v1700_v54 = vpop.eup %1699 }
 0x676   :  { %v1702_v55 = vpop.eup %1701  ;;  %v513_v57 = vadd.f32 1.0, %v1700_v54 }
 0x677   :  { %v538_v62 = vadd.f32 1.0, %v1702_v55 }
 0x678   :  { %1703 = vrcp.f32 %v513_v57 }
 0x679   :  { %1705 = vrcp.f32 %v538_v62 }
 0x682   :  { %v1704_v63 = vpop.eup %1703 }
 0x683   :  { %v1706_v2 = vpop.eup %1705  ;;  %v517_v10 = vmul.f32 %v1704_v63, %v387_v33 }
 0x684   :  { %v542_v12 = vmul.f32 %v1706_v2, %v419_v35 }
 0x6e6   :  { %v520_v0 = vpop.permute.xlu0 %519 }
 0x6e7   :  { %v522_v4 = vmul.f32 %v1704_v63, %v520_v0  ;;  %v545_v5 = vpop.permute.xlu1 %544 }
 0x6e8   :  { %v547_v6 = vmul.f32 %v1706_v2, %v545_v5 }
 0x6e9   :  { %524 = vrot.lane.b32.xlu0 %v522_v4, %s1825_s2 }
 0x6ea   :  { %549 = vrot.lane.b32.xlu1 %v547_v6, %s1825_s2 }
 0x75b   :  { %v525_v11 = vpop.permute.xlu0 %524 }
 0x75c   :  { %v527_v13 = vadd.f32 %v525_v11, %v517_v10  ;;  %v550_v14 = vpop.permute.xlu1 %549  ;;  %v156_v10 = vadd.f32 %v1981_v32, %v2022_v59 }
 0x75d   :  { %v552_v15 = vadd.f32 %v550_v14, %v542_v12 }
 0x75e   :  { %1707 = vtanh.f32 %v527_v13 }
 0x75f   :  { %1709 = vtanh.f32 %v552_v15 }
 0x768   :  { %v1708_v17 = vpop.eup %1707 }
 0x769   :  { %v1710_v18 = vpop.eup %1709  ;;  %530 = vrot.lane.b32.xlu0 %v1708_v17, %s1824_s18 }
 0x76a   :  { %555 = vrot.lane.b32.xlu1 %v1710_v18, %s1824_s18 }
 0x7db   :  { %v531_v20 = vpop.permute.xlu0 %530 }
 0x7dc   :  { %v533_v21 = vmul.f32 %v1704_v63, %v531_v20  ;;  %v556_v22 = vpop.permute.xlu1 %555 }
 0x7dd   :  { %v558_v23 = vmul.f32 %v1706_v2, %v556_v22 }
 0x7de   :  { %560 = vrot.lane.b32.xlu0 %v533_v21, %s1825_s2 }
 0x7df   :  { %564 = vrot.lane.b32.xlu1 %v558_v23, %s1824_s18 }
 0x850   :  { %v561_v24 = vpop.permute.xlu0 %560 }
 0x851   :  { %v565_v27 = vpop.permute.xlu1 %564 }
 0x852   :  { %v567_v28 = vsel %vm293_vm1, %v561_v24, %v565_v27 }
 0x853   :  { %1450 = vmatmul.mubr.msk.f32.vlgmr.msra.gmra.mrb[10].mxu0 %vm190_vm2, %v567_v28 }
 0x854   :  { %1598 = vmatpush1.bf16.msra.mxu0 %v1890_v8  ;;  %901 = vmatprep.mubr.f32.mxu0 %v1823_v7 }
 0x855   :  { %1600 = vmatprep.subr.bf16.mxu0 %v1892_v9 }
 0x858   :  { %1602 = vmatpush1.bf16.msra.mxu0 %v1914_v16 }
 0x859   :  { %1604 = vmatprep.subr.bf16.mxu0 %v1920_v19 }
 0x85c   :  { %1606 = vmatpush1.bf16.msra.mxu0 %v1939_v25 }
 0x85d   :  { %1608 = vmatprep.subr.bf16.mxu0 %v1943_v26 }
 0x860   :  { %1610 = vmatpush1.bf16.msra.mxu0 %v1954_v29 }
 0x861   :  { %1628 = vmatprep.subr.bf16.mxu0 %v1878_v3 }
 0x926   :  { %v637_v31 = vpop.f32.mrb[10].mxu0 }
 0x927   :  { %v642_v33 = vadd.f32 %v637_v31, %v151_v30  ;;  %v639_v34 = vpop.f32.mrb[11].mxu0 }
 0x928   :  { %v667_v35 = vadd.f32 %v2044_v1, %v639_v34 }
 0x929   :  { %1711 = vtanh.f32 %v642_v33  ;;  %v1451_v38 = vmul.f32 -1.442695, %v642_v33 }
 0x92a   :  { %1713 = vtanh.f32 %v667_v35  ;;  %v1452_v39 = vmul.f32 -1.442695, %v667_v35 }
 0x92b   :  { %1715 = vpow2.f32 %v1451_v38 }
 0x92c   :  { %1717 = vpow2.f32 %v1452_v39 }
 0x933   :  { %v1712_v36 = vpop.eup %1711 }
 0x934   :  { %v1714_v37 = vpop.eup %1713  ;;  %652 = vrot.lane.b32.xlu0 %v1712_v36, %s1824_s18 }
 0x935   :  { %677 = vrot.lane.b32.xlu1 %v1714_v37, %s1824_s18  ;;  %v1716_v40 = vpop.eup %1715 }
 0x936   :  { %v1718_v41 = vpop.eup %1717  ;;  %v646_v56 = vadd.f32 1.0, %v1716_v40 }
 0x937   :  { %v671_v42 = vadd.f32 1.0, %v1718_v41 }
 0x938   :  { %1719 = vrcp.f32 %v646_v56 }
 0x939   :  { %1721 = vrcp.f32 %v671_v42 }
 0x942   :  { %v1720_v43 = vpop.eup %1719 }
 0x943   :  { %v1722_v45 = vpop.eup %1721  ;;  %v650_v49 = vmul.f32 %v1720_v43, %v527_v13 }
 0x944   :  { %v675_v51 = vmul.f32 %v1722_v45, %v552_v15 }
 0x9a6   :  { %v653_v44 = vpop.permute.xlu0 %652 }
 0x9a7   :  { %v655_v46 = vmul.f32 %v1720_v43, %v653_v44  ;;  %v678_v47 = vpop.permute.xlu1 %677 }
 0x9a8   :  { %v680_v48 = vmul.f32 %v1722_v45, %v678_v47  ;;  %v161_v47 = vadd.f32 %v2020_v58, %v1981_v32 }
 0x9a9   :  { %657 = vrot.lane.b32.xlu0 %v655_v46, %s1825_s2 }
 0x9aa   :  { %682 = vrot.lane.b32.xlu1 %v680_v48, %s1825_s2 }
 0xa1b   :  { %v658_v50 = vpop.permute.xlu0 %657 }
 0xa1c   :  { %v660_v52 = vadd.f32 %v658_v50, %v650_v49  ;;  %v683_v53 = vpop.permute.xlu1 %682 }
 0xa1d   :  { %v685_v54 = vadd.f32 %v683_v53, %v675_v51 }
 0xa1e   :  { %1723 = vtanh.f32 %v660_v52 }
 0xa1f   :  { %1725 = vtanh.f32 %v685_v54 }
 0xa28   :  { %v1724_v55 = vpop.eup %1723 }
 0xa29   :  { %v1726_v57 = vpop.eup %1725  ;;  %663 = vrot.lane.b32.xlu0 %v1724_v55, %s1824_s18 }
 0xa2a   :  { %688 = vrot.lane.b32.xlu1 %v1726_v57, %s1824_s18 }
 0xa9b   :  { %v664_v62 = vpop.permute.xlu0 %663 }
 0xa9c   :  { %v666_v63 = vmul.f32 %v1720_v43, %v664_v62  ;;  %v689_v0 = vpop.permute.xlu1 %688 }
 0xa9d   :  { %v691_v2 = vmul.f32 %v1722_v45, %v689_v0 }
 0xa9e   :  { %693 = vrot.lane.b32.xlu0 %v666_v63, %s1825_s2 }
 0xa9f   :  { %697 = vrot.lane.b32.xlu1 %v691_v2, %s1824_s18 }
 0xb10   :  { %v694_v4 = vpop.permute.xlu0 %693 }
 0xb11   :  { %v698_v5 = vpop.permute.xlu1 %697 }
 0xb12   :  { %v700_v6 = vsel %vm293_vm1, %v694_v4, %v698_v5 }
 0xb13   :  { %1453 = vmatmul.mubr.msk.f32.vlgmr.msra.gmra.mrb[4].mxu1 %vm190_vm2, %v700_v6 }
 0xb14   :  { %1614 = vmatpush1.bf16.msra.mxu1 %v1890_v8  ;;  %1034 = vmatprep.mubr.f32.mxu1 %v1823_v7 }
 0xb15   :  { %1616 = vmatprep.subr.bf16.mxu1 %v1892_v9 }
 0xb18   :  { %1618 = vmatpush1.bf16.msra.mxu1 %v1914_v16 }
 0xb19   :  { %1620 = vmatprep.subr.bf16.mxu1 %v1920_v19 }
 0xb1c   :  { %1622 = vmatpush1.bf16.msra.mxu1 %v1939_v25 }
 0xb1d   :  { %1624 = vmatprep.subr.bf16.mxu1 %v1943_v26 }
 0xb20   :  { %1626 = vmatpush1.bf16.msra.mxu1 %v1954_v29 }
 0xb21   :  { %1644 = vmatprep.subr.bf16.mxu1 %v1878_v3 }
 0xbe6   :  { %v770_v11 = vpop.f32.mrb[4].mxu1 }
 0xbe7   :  { %v775_v12 = vadd.f32 %v770_v11, %v156_v10  ;;  %v772_v13 = vpop.f32.mrb[5].mxu1 }
 0xbe8   :  { %v800_v14 = vadd.f32 %v2044_v1, %v772_v13 }
 0xbe9   :  { %1727 = vtanh.f32 %v775_v12  ;;  %v1454_v18 = vmul.f32 -1.442695, %v775_v12 }
 0xbea   :  { %1729 = vtanh.f32 %v800_v14  ;;  %v1455_v20 = vmul.f32 -1.442695, %v800_v14 }
 0xbeb   :  { %1731 = vpow2.f32 %v1454_v18 }
 0xbec   :  { %1733 = vpow2.f32 %v1455_v20 }
 0xbf3   :  { %v1728_v15 = vpop.eup %1727 }
 0xbf4   :  { %v1730_v17 = vpop.eup %1729  ;;  %785 = vrot.lane.b32.xlu0 %v1728_v15, %s1824_s18 }
 0xbf5   :  { %810 = vrot.lane.b32.xlu1 %v1730_v17, %s1824_s18  ;;  %v1732_v3 = vpop.eup %1731 }
 0xbf6   :  { %v1734_v21 = vpop.eup %1733  ;;  %v779_v59 = vadd.f32 1.0, %v1732_v3 }
 0xbf7   :  { %v804_v22 = vadd.f32 1.0, %v1734_v21 }
 0xbf8   :  { %1735 = vrcp.f32 %v779_v59 }
 0xbf9   :  { %1737 = vrcp.f32 %v804_v22 }
 0xc02   :  { %v1736_v23 = vpop.eup %1735 }
 0xc03   :  { %v1738_v27 = vpop.eup %1737  ;;  %v783_v33 = vmul.f32 %v1736_v23, %v660_v52 }
 0xc04   :  { %v808_v35 = vmul.f32 %v1738_v27, %v685_v54 }
 0xc66   :  { %v786_v24 = vpop.permute.xlu0 %785 }
 0xc67   :  { %v788_v28 = vmul.f32 %v1736_v23, %v786_v24  ;;  %v811_v30 = vpop.permute.xlu1 %810 }
 0xc68   :  { %v813_v31 = vmul.f32 %v1738_v27, %v811_v30 }
 0xc69   :  { %790 = vrot.lane.b32.xlu0 %v788_v28, %s1825_s2  ;;  %v166_v28 = vadd.f32 %v1981_v32, %v2026_v61 }
 0xc6a   :  { %815 = vrot.lane.b32.xlu1 %v813_v31, %s1825_s2 }
 0xcdb   :  { %v791_v34 = vpop.permute.xlu0 %790 }
 0xcdc   :  { %v793_v36 = vadd.f32 %v791_v34, %v783_v33  ;;  %v816_v37 = vpop.permute.xlu1 %815 }
 0xcdd   :  { %v818_v38 = vadd.f32 %v816_v37, %v808_v35 }
 0xcde   :  { %1739 = vtanh.f32 %v793_v36 }
 0xcdf   :  { %1741 = vtanh.f32 %v818_v38 }
 0xce8   :  { %v1740_v39 = vpop.eup %1739 }
 0xce9   :  { %v1742_v40 = vpop.eup %1741  ;;  %796 = vrot.lane.b32.xlu0 %v1740_v39, %s1824_s18 }
 0xcea   :  { %821 = vrot.lane.b32.xlu1 %v1742_v40, %s1824_s18 }
 0xd5b   :  { %v797_v41 = vpop.permute.xlu0 %796 }
 0xd5c   :  { %v799_v56 = vmul.f32 %v1736_v23, %v797_v41  ;;  %v822_v42 = vpop.permute.xlu1 %821 }
 0xd5d   :  { %v824_v43 = vmul.f32 %v1738_v27, %v822_v42 }
 0xd5e   :  { %826 = vrot.lane.b32.xlu0 %v799_v56, %s1825_s2 }
 0xd5f   :  { %830 = vrot.lane.b32.xlu1 %v824_v43, %s1824_s18 }
 0xdd0   :  { %v827_v44 = vpop.permute.xlu0 %826 }
 0xdd1   :  { %v831_v45 = vpop.permute.xlu1 %830 }
 0xdd2   :  { %v833_v46 = vsel %vm293_vm1, %v827_v44, %v831_v45 }
 0xdd3   :  { %1456 = vmatmul.mubr.msk.f32.vlgmr.msra.gmra.mrb[12].mxu0 %vm190_vm2, %v833_v46 }
 0xdd4   :  { %1630 = vmatpush1.bf16.msra.mxu0 %v1890_v8  ;;  %1167 = vmatprep.mubr.f32.mxu0 %v1823_v7 }
 0xdd5   :  { %1632 = vmatprep.subr.bf16.mxu0 %v1892_v9 }
 0xdd8   :  { %1634 = vmatpush1.bf16.msra.mxu0 %v1914_v16 }
 0xdd9   :  { %1636 = vmatprep.subr.bf16.mxu0 %v1920_v19 }
 0xddc   :  { %1638 = vmatpush1.bf16.msra.mxu0 %v1939_v25 }
 0xddd   :  { %1640 = vmatprep.subr.bf16.mxu0 %v1943_v26 }
 0xde0   :  { %1642 = vmatpush1.bf16.msra.mxu0 %v1954_v29 }
 0xea6   :  { %v903_v48 = vpop.f32.mrb[12].mxu0 }
 0xea7   :  { %v908_v49 = vadd.f32 %v903_v48, %v161_v47  ;;  %v905_v50 = vpop.f32.mrb[13].mxu0 }
 0xea8   :  { %v933_v51 = vadd.f32 %v2044_v1, %v905_v50 }
 0xea9   :  { %1743 = vtanh.f32 %v908_v49  ;;  %v1457_v54 = vmul.f32 -1.442695, %v908_v49 }
 0xeaa   :  { %1745 = vtanh.f32 %v933_v51  ;;  %v1458_v55 = vmul.f32 -1.442695, %v933_v51 }
 0xeab   :  { %1747 = vpow2.f32 %v1457_v54 }
 0xeac   :  { %1749 = vpow2.f32 %v1458_v55  ;;  %v171_v55 = vadd.f32 %v2024_v60, %v1981_v32 }
 0xeb3   :  { %v1744_v52 = vpop.eup %1743 }
 0xeb4   :  { %v1746_v53 = vpop.eup %1745  ;;  %918 = vrot.lane.b32.xlu0 %v1744_v52, %s1824_s18 }
 0xeb5   :  { %943 = vrot.lane.b32.xlu1 %v1746_v53, %s1824_s18  ;;  %v1748_v57 = vpop.eup %1747 }
 0xeb6   :  { %v1750_v62 = vpop.eup %1749  ;;  %v912_v58 = vadd.f32 1.0, %v1748_v57 }
 0xeb7   :  { %v937_v63 = vadd.f32 1.0, %v1750_v62 }
 0xeb8   :  { %1751 = vrcp.f32 %v912_v58 }
 0xeb9   :  { %1753 = vrcp.f32 %v937_v63 }
 0xec2   :  { %v1752_v0 = vpop.eup %1751 }
 0xec3   :  { %v1754_v4 = vpop.eup %1753  ;;  %v916_v11 = vmul.f32 %v1752_v0, %v793_v36 }
 0xec4   :  { %v941_v13 = vmul.f32 %v1754_v4, %v818_v38 }
 0xf26   :  { %v919_v2 = vpop.permute.xlu0 %918 }
 0xf27   :  { %v921_v5 = vmul.f32 %v1752_v0, %v919_v2  ;;  %v944_v6 = vpop.permute.xlu1 %943 }
 0xf28   :  { %v946_v10 = vmul.f32 %v1754_v4, %v944_v6 }
 0xf29   :  { %923 = vrot.lane.b32.xlu0 %v921_v5, %s1825_s2 }
 0xf2a   :  { %948 = vrot.lane.b32.xlu1 %v946_v10, %s1825_s2 }
 0xf9b   :  { %v924_v12 = vpop.permute.xlu0 %923 }
 0xf9c   :  { %v926_v14 = vadd.f32 %v924_v12, %v916_v11  ;;  %v949_v15 = vpop.permute.xlu1 %948 }
 0xf9d   :  { %v951_v17 = vadd.f32 %v949_v15, %v941_v13 }
 0xf9e   :  { %1755 = vtanh.f32 %v926_v14 }
 0xf9f   :  { %1757 = vtanh.f32 %v951_v17 }
 0xfa8   :  { %v1756_v18 = vpop.eup %1755 }
 0xfa9   :  { %v1758_v20 = vpop.eup %1757  ;;  %929 = vrot.lane.b32.xlu0 %v1756_v18, %s1824_s18 }
 0xfaa   :  { %954 = vrot.lane.b32.xlu1 %v1758_v20, %s1824_s18 }
0x101b   :  { %v930_v3 = vpop.permute.xlu0 %929 }
0x101c   :  { %v932_v21 = vmul.f32 %v1752_v0, %v930_v3  ;;  %v955_v59 = vpop.permute.xlu1 %954 }
0x101d   :  { %v957_v22 = vmul.f32 %v1754_v4, %v955_v59 }
0x101e   :  { %959 = vrot.lane.b32.xlu0 %v932_v21, %s1825_s2 }
0x101f   :  { %963 = vrot.lane.b32.xlu1 %v957_v22, %s1824_s18 }
0x1090   :  { %v960_v23 = vpop.permute.xlu0 %959 }
0x1091   :  { %v964_v24 = vpop.permute.xlu1 %963 }
0x1092   :  { %v966_v27 = vsel %vm293_vm1, %v960_v23, %v964_v24 }
0x1093   :  { %1459 = vmatmul.mubr.msk.f32.vlgmr.msra.gmra.mrb[6].mxu1 %vm190_vm2, %v966_v27 }
0x1094   :  { %1646 = vmatpush1.bf16.msra.mxu1 %v1890_v8  ;;  %1300 = vmatprep.mubr.f32.mxu1 %v1823_v7 }
0x1095   :  { %1648 = vmatprep.subr.bf16.mxu1 %v1892_v9 }
0x1098   :  { %1650 = vmatpush1.bf16.msra.mxu1 %v1914_v16 }
0x1099   :  { %1652 = vmatprep.subr.bf16.mxu1 %v1920_v19 }
0x109c   :  { %1654 = vmatpush1.bf16.msra.mxu1 %v1939_v25 }
0x109d   :  { %1656 = vmatprep.subr.bf16.mxu1 %v1943_v26 }
0x10a0   :  { %1658 = vmatpush1.bf16.msra.mxu1 %v1954_v29 }
0x1166   :  { %v1036_v30 = vpop.f32.mrb[6].mxu1 }
0x1167   :  { %v1041_v31 = vadd.f32 %v1036_v30, %v166_v28  ;;  %v1038_v8 = vpop.f32.mrb[7].mxu1 }
0x1168   :  { %v1066_v33 = vadd.f32 %v2044_v1, %v1038_v8 }
0x1169   :  { %1759 = vtanh.f32 %v1041_v31  ;;  %v1460_v19 = vmul.f32 -1.442695, %v1041_v31 }
0x116a   :  { %1761 = vtanh.f32 %v1066_v33  ;;  %v1461_v25 = vmul.f32 -1.442695, %v1066_v33 }
0x116b   :  { %1763 = vpow2.f32 %v1460_v19 }
0x116c   :  { %1765 = vpow2.f32 %v1461_v25 }
0x1173   :  { %v1760_v9 = vpop.eup %1759 }
0x1174   :  { %v1762_v16 = vpop.eup %1761  ;;  %1051 = vrot.lane.b32.xlu0 %v1760_v9, %s1824_s18 }
0x1175   :  { %1076 = vrot.lane.b32.xlu1 %v1762_v16, %s1824_s18  ;;  %v1764_v26 = vpop.eup %1763 }
0x1176   :  { %v1766_v29 = vpop.eup %1765  ;;  %v1045_v61 = vadd.f32 1.0, %v1764_v26 }
0x1177   :  { %v1070_v34 = vadd.f32 1.0, %v1766_v29 }
0x1178   :  { %1767 = vrcp.f32 %v1045_v61 }
0x1179   :  { %1769 = vrcp.f32 %v1070_v34 }
0x1182   :  { %v1768_v35 = vpop.eup %1767 }
0x1183   :  { %v1770_v37 = vpop.eup %1769  ;;  %v1049_v41 = vmul.f32 %v1768_v35, %v926_v14 }
0x1184   :  { %v1074_v42 = vmul.f32 %v1770_v37, %v951_v17 }
0x11e6   :  { %v1052_v36 = vpop.permute.xlu0 %1051 }
0x11e7   :  { %v1054_v38 = vmul.f32 %v1768_v35, %v1052_v36  ;;  %v1077_v39 = vpop.permute.xlu1 %1076 }
0x11e8   :  { %v1079_v40 = vmul.f32 %v1770_v37, %v1077_v39 }
0x11e9   :  { %1056 = vrot.lane.b32.xlu0 %v1054_v38, %s1825_s2 }
0x11ea   :  { %1081 = vrot.lane.b32.xlu1 %v1079_v40, %s1825_s2 }
0x125b   :  { %v1057_v56 = vpop.permute.xlu0 %1056 }
0x125c   :  { %v1059_v43 = vadd.f32 %v1057_v56, %v1049_v41  ;;  %v1082_v44 = vpop.permute.xlu1 %1081  ;;  %v1332_v41 = vld [vmem:[%s2218_s5 + $0x8] sm:$0xff]  ;;  %v1333_v56 = vld [vmem:[%s2218_s5 + $0x10] sm:$0xff] }
0x125d   :  { %v1084_v45 = vadd.f32 %v1082_v44, %v1074_v42  ;;  %v1826_v42 = vmov 0.0|0.0   ;;  %v1334_v44 = vld [vmem:[%s2218_s5 + $0x18] sm:$0xff] }
0x125e   :  { %1771 = vtanh.f32 %v1059_v43  ;;  %1659 = vmatprep.subr.bf16.mxu0 %v1826_v42 }
0x125f   :  { %1773 = vtanh.f32 %v1084_v45 }
0x1268   :  { %v1772_v46 = vpop.eup %1771 }
0x1269   :  { %v1774_v47 = vpop.eup %1773  ;;  %1062 = vrot.lane.b32.xlu0 %v1772_v46, %s1824_s18 }
0x126a   :  { %1087 = vrot.lane.b32.xlu1 %v1774_v47, %s1824_s18 }
0x12db   :  { %v1063_v48 = vpop.permute.xlu0 %1062 }
0x12dc   :  { %v1065_v49 = vmul.f32 %v1768_v35, %v1063_v48  ;;  %v1088_v50 = vpop.permute.xlu1 %1087 }
0x12dd   :  { %v1090_v51 = vmul.f32 %v1770_v37, %v1088_v50  ;;  %v1467_v50 = vld [vmem:[%s2219_s6] ss:$0 sm:$0xff] }
0x12de   :  { %1092 = vrot.lane.b32.xlu0 %v1065_v49, %s1825_s2 }
0x12df   :  { %1096 = vrot.lane.b32.xlu1 %v1090_v51, %s1824_s18 }
0x1350   :  { %v1093_v52 = vpop.permute.xlu0 %1092 }
0x1351   :  { %v1097_v53 = vpop.permute.xlu1 %1096 }
0x1352   :  { %v1099_v54 = vsel %vm293_vm1, %v1093_v52, %v1097_v53 }
0x1353   :  { %1462 = vmatmul.mubr.msk.f32.vlgmr.msra.gmra.mrb[14].mxu0 %vm190_vm2, %v1099_v54 }
0x1354   :  { %1508 = vmatprep.mubr.msk.f32.mxu0 %vm1827_vm3, %v1823_v7 }
0x1426   :  { %v1169_v57 = vpop.f32.mrb[14].mxu0 }
0x1427   :  { %v1174_v62 = vadd.f32 %v1169_v57, %v171_v55  ;;  %v1171_v58 = vpop.f32.mrb[15].mxu0 }
0x1428   :  { %v1199_v63 = vadd.f32 %v2044_v1, %v1171_v58 }
0x1429   :  { %1775 = vtanh.f32 %v1174_v62  ;;  %v1463_v4 = vmul.f32 -1.442695, %v1174_v62 }
0x142a   :  { %1777 = vtanh.f32 %v1199_v63  ;;  %v1464_v5 = vmul.f32 -1.442695, %v1199_v63 }
0x142b   :  { %1779 = vpow2.f32 %v1463_v4 }
0x142c   :  { %1781 = vpow2.f32 %v1464_v5 }
0x1433   :  { %v1776_v0 = vpop.eup %1775 }
0x1434   :  { %v1778_v2 = vpop.eup %1777  ;;  %1184 = vrot.lane.b32.xlu0 %v1776_v0, %s1824_s18 }
0x1435   :  { %1209 = vrot.lane.b32.xlu1 %v1778_v2, %s1824_s18  ;;  %v1780_v6 = vpop.eup %1779 }
0x1436   :  { %v1782_v10 = vpop.eup %1781  ;;  %v1178_v32 = vadd.f32 1.0, %v1780_v6 }
0x1437   :  { %v1203_v60 = vadd.f32 1.0, %v1782_v10 }
0x1438   :  { %1783 = vrcp.f32 %v1178_v32 }
0x1439   :  { %1785 = vrcp.f32 %v1203_v60 }
0x1442   :  { %v1784_v11 = vpop.eup %1783 }
0x1443   :  { %v1786_v13 = vpop.eup %1785  ;;  %v1182_v18 = vmul.f32 %v1784_v11, %v1059_v43 }
0x1444   :  { %v1207_v3 = vmul.f32 %v1786_v13, %v1084_v45  ;;  %v1663_v45 = vpack.c.bf16 %v1334_v44, %v1333_v56 }
0x14a6   :  { %v1185_v12 = vpop.permute.xlu0 %1184 }
0x14a7   :  { %v1187_v14 = vmul.f32 %v1784_v11, %v1185_v12  ;;  %v1210_v15 = vpop.permute.xlu1 %1209 }
0x14a8   :  { %v1212_v17 = vmul.f32 %v1786_v13, %v1210_v15 }
0x14a9   :  { %1189 = vrot.lane.b32.xlu0 %v1187_v14, %s1825_s2 }
0x14aa   :  { %1214 = vrot.lane.b32.xlu1 %v1212_v17, %s1825_s2 }
0x151b   :  { %v1190_v20 = vpop.permute.xlu0 %1189 }
0x151c   :  { %v1192_v21 = vadd.f32 %v1190_v20, %v1182_v18  ;;  %v1215_v59 = vpop.permute.xlu1 %1214 }
0x151d   :  { %v1217_v22 = vadd.f32 %v1215_v59, %v1207_v3 }
0x151e   :  { %1787 = vtanh.f32 %v1192_v21 }
0x151f   :  { %1789 = vtanh.f32 %v1217_v22 }
0x1528   :  { %v1788_v23 = vpop.eup %1787 }
0x1529   :  { %v1790_v24 = vpop.eup %1789  ;;  %1195 = vrot.lane.b32.xlu0 %v1788_v23, %s1824_s18 }
0x152a   :  { %1220 = vrot.lane.b32.xlu1 %v1790_v24, %s1824_s18 }
0x159b   :  { %v1196_v27 = vpop.permute.xlu0 %1195 }
0x159c   :  { %v1198_v28 = vmul.f32 %v1784_v11, %v1196_v27  ;;  %v1221_v30 = vpop.permute.xlu1 %1220 }
0x159d   :  { %v1223_v31 = vmul.f32 %v1786_v13, %v1221_v30 }
0x159e   :  { %1225 = vrot.lane.b32.xlu0 %v1198_v28, %s1825_s2 }
0x159f   :  { %1229 = vrot.lane.b32.xlu1 %v1223_v31, %s1824_s18 }
0x1610   :  { %v1226_v8 = vpop.permute.xlu0 %1225 }
0x1611   :  { %v1230_v33 = vpop.permute.xlu1 %1229 }
0x1612   :  { %v1232_v9 = vsel %vm293_vm1, %v1226_v8, %v1230_v33 }
0x1613   :  { %1465 = vmatmul.mubr.msk.f32.vlgmr.msra.gmra.mrb[8].mxu1 %vm190_vm2, %v1232_v9 }
0x16e6   :  { %v1302_v16 = vpop.f32.mrb[8].mxu1 }
0x16e7   :  { %v1303_v19 = vpop.f32.mrb[9].mxu1 }
0x16e8   :  { %v1306_v25 = vadd.f32 %v2044_v1, %v1303_v19  ;;  %v1331_v1 = vld [vmem:[%s2218_s5] sm:$0xff]  ;;  %s1828_s5 = smov [#allocation2]  }
0x16e9   :  { %v1660_v43 = vpack.c.bf16 %v1332_v41, %v1331_v1  ;;  %s1425_s3 = sshll.u32 %s1828_s5, 4  ;;  %s1426_s3 = int_to_ptr.vmem [resolvable:$true] %s1425_s3 }
0x16ea   :  { %1791 = vtanh.f32 %v1306_v25  ;;  %v1466_v29 = vmul.f32 -1.442695, %v1306_v25  ;;  %s1799_s17 = scalar_lea.vmem %s1426_s3, 32  ;;  %p1804_p1 = scmp.lt.s32.totalorder %s1426_s3, %s1426_s3 }
0x16eb   :  { %1661 = vmatpush3.bf16.msra.mxu0 %v1660_v43  ;;  %p1800_p0 = scmp.ne.s32.totalorder %s1426_s3, %s1799_s17  ;;  %p1805_p2 = scmp.lt.s32.totalorder %s1799_s17, %s1799_s17 }
0x16ec   :  { %1793 = vpow2.f32 %v1466_v29  ;;  %1662 = vmatprep.subr.bf16.mxu0 %v1826_v42 }
0x16ed   :  { %p1806_p3 = por %p1805_p2, %p1804_p1 }
0x16ef   :  { %1664 = vmatpush3.bf16.msra.mxu0 %v1663_v45  ;;  %p1807_p4 = pnand %p1806_p3, %p1800_p0 }
0x16f4   :  { %v1792_v26 = vpop.eup %1791 }
0x16f5   :  { %1316 = vrot.lane.b32.xlu0 %v1792_v26, %s1824_s18 }
0x16f6   :  { %v1794_v61 = vpop.eup %1793 }
0x16f7   :  { %v1310_v34 = vadd.f32 1.0, %v1794_v61 }
0x16f9   :  { %1795 = vrcp.f32 %v1310_v34 }
0x1703   :  { %v1796_v35 = vpop.eup %1795 }
0x1704   :  { %v1314_v38 = vmul.f32 %v1796_v35, %v1217_v22 }
0x1767   :  { %v1317_v36 = vpop.permute.xlu0 %1316 }
0x1768   :  { %v1319_v37 = vmul.f32 %v1796_v35, %v1317_v36 }
0x176a   :  { %1321 = vrot.lane.b32.xlu1 %v1319_v37, %s1825_s2 }
0x17dc   :  { %v1322_v39 = vpop.permute.xlu1 %1321 }
0x17dd   :  { %v1324_v40 = vadd.f32 %v1322_v39, %v1314_v38 }
0x17df   :  { %1797 = vtanh.f32 %v1324_v40 }
0x17e9   :  { %v1798_v46 = vpop.eup %1797 }
0x17ea   :  { %1327 = vrot.lane.b32.xlu0 %v1798_v46, %s1824_s18 }
0x185c   :  { %v1328_v47 = vpop.permute.xlu0 %1327 }
0x185d   :  { %v1330_v48 = vmul.f32 %v1796_v35, %v1328_v47 }
0x185f   :  { %1343 = vrot.lane.b32.xlu1 %v1330_v48, %s1825_s2 }
0x18d1   :  { %v1344_v49 = vpop.permute.xlu1 %1343 }
0x18d2   :  { %1509 = vmatmul.mubr.msk.f32.vlgmr.msra.gmra.mrb[16].mxu0 %vm293_vm1, %v1344_v49 }
0x19a5   :  { %v1413_v7 = vpop.f32.mrb[16].mxu0 }
0x19a6   :  { %v1414_v51 = vadd.f32 %v1467_v50, %v1413_v7  ;;  %v1510_v52 = vpop.f32.mrb[17].mxu0 }
0x19a8   :  { %1418 = vst.msk [vmem:[#allocation2] sm:$0x3] %vm1417_vm4, %v1414_v51 }
0x19a9   :  { %1810 = shalt.err (!%p1807_p4)
}
0x19aa   :  { %s1811_s19 = scalar_lea.hbm %s2220_s7, 32 }
0x19ab   :  { %p1812_p5 = scmp.ne.s32.totalorder %s2220_s7, %s1811_s19  ;;  %p1815_p6 = scmp.lt.u32.totalorder %s1811_s19, %s2220_s7 }
0x19ad   :  { %p1817_p7 = pnand %p1815_p6, %p1812_p5 }
0x19af   :  { %1820 = shalt.err (!%p1817_p7)
}
0x19b0   :  { %1428 = dma.vmem_to_hbm [thread:$0]  %s1426_s3, 32, %s2220_s7, [#allocation3]  }
0x19b1   :  { %1821 = dma.done.wait [#allocation3], 32  }
0x19b2   :  { %1822 = vsyncadd [#allocation3], 4294967264 }
0x19b3   :  { %1432 = vsyncpa [#allocation3], 1 }

</bundles_post_ra>
